<compile_context>
chip_gen: v7x
topology: tpu7x:2x2x1
jax: 0.10.0
libtpu: 0.0.40
codegen_flags: <defaults>
</compile_context>

<pallas_src>
import jax
import jax.numpy as jnp
from jax.experimental import pallas as pl
from jax.experimental.pallas import tpu as pltpu


# ----------------------------------------------------------------------------
# Kernel factory (T, H static).
# ----------------------------------------------------------------------------
def _make_kernel(*, T, H):
    f32 = jnp.float32
    bf16 = jnp.bfloat16
    H3 = 3 * H

    def kernel(emb_gates_ref,   # (T, B, 3H) f32  W0e[top1] + bih0 + bcs@Wih0_c
               hid_init_ref,    # (2, B, H)  f32
               prev_init_ref,   # (B, Wd, 1) f32  initial attention
               enc_b_ref,       # (B, Wd, H) f32  encoder output (batch-major)
               encp_ref,        # (B, Wd, H) f32  enc @ We + ba (precomputed)
               negmask_ref,     # (B, Wd, 1) f32  0 / -1e30 length mask
               whall_ref,       # (2H, 7H)   bf16 [[Whh0,Wh_t,0],[0,Wh_b,Whh1]]
               w0c_ref,         # (H, 3H)    bf16 folded ctx_shrink -> GRU0 in
               wih1_ref,        # (H, 3H)    bf16
               wout_ref,        # (H, V)     bf16
               bhh0_ref,        # (1, 3H)    f32
               bih1_ref,        # (1, 3H)    f32
               bhh1_ref,        # (1, 3H)    f32
               bout_ref,        # (1, V)     f32
               wloc_ref,        # (1, H)     f32
               v_ref,           # (1, H)     f32
               logits_ref,      # (T, B, V)  f32
               hid_out_ref,     # (2, B, H)  f32
               attn_out_ref):   # (T, B, Wd, 1) f32
        # Loop-invariant values hoisted out of the per-step loop.
        enc_b = enc_b_ref[...]
        encp = encp_ref[...]
        negmask = negmask_ref[...]
        wloc3 = wloc_ref[...].reshape(1, 1, H)
        v3 = v_ref[...].reshape(1, 1, H)
        bhh0 = bhh0_ref[...]
        bih1 = bih1_ref[...]
        bhh1 = bhh1_ref[...]
        bout = bout_ref[...]

        def step(t, carry):
            h0, h1, attn = carry              # (B,H), (B,H), (B,Wd,1) f32

            # ---- one fused matmul for every old-hidden projection ----------
            hcat = jnp.concatenate([h0, h1], axis=1).astype(bf16)      # (B,2H)
            hres = jnp.dot(hcat, whall_ref[...],
                           preferred_element_type=f32)                 # (B,7H)
            gh0 = hres[:, :H3] + bhh0                                  # (B,3H)
            hid_proj = hres[:, H3:H3 + H]                              # (B,H)
            gh1 = hres[:, H3 + H:] + bhh1                              # (B,3H)

            # ---- content + location attention, masked softmax (batched) ----
            arg = encp + hid_proj[:, None, :] + attn * wloc3           # (B,Wd,H)
            e = jnp.tanh(arg)
            sc = jnp.sum(e * v3, axis=-1, keepdims=True) + negmask     # (B,Wd,1)
            sc = sc - jnp.max(sc, axis=1, keepdims=True)
            ex = jnp.exp(sc)
            attn_new = ex / jnp.sum(ex, axis=1, keepdims=True)         # exact
            ctx = jnp.sum(attn_new * enc_b, axis=1)                    # (B,H)

            # ---- GRU layer 0 (embedding + context_shrink folded) -----------
            gi0 = emb_gates_ref[t] + jnp.dot(ctx.astype(bf16), w0c_ref[...],
                                             preferred_element_type=f32)
            r0 = jax.nn.sigmoid(gi0[:, :H] + gh0[:, :H])
            z0 = jax.nn.sigmoid(gi0[:, H:2 * H] + gh0[:, H:2 * H])
            n0 = jnp.tanh(gi0[:, 2 * H:] + r0 * gh0[:, 2 * H:])
            h0n = (1.0 - z0) * n0 + z0 * h0

            # ---- GRU layer 1 ------------------------------------------------
            # TODO(synk): nn.GRU inter-layer dropout (p=0.5) is train-only; omitted.
            gi1 = jnp.dot(h0n.astype(bf16), wih1_ref[...],
                          preferred_element_type=f32) + bih1
            r1 = jax.nn.sigmoid(gi1[:, :H] + gh1[:, :H])
            z1 = jax.nn.sigmoid(gi1[:, H:2 * H] + gh1[:, H:2 * H])
            n1 = jnp.tanh(gi1[:, 2 * H:] + r1 * gh1[:, 2 * H:])
            h1n = (1.0 - z1) * n1 + z1 * h1

            # ---- outputs -----------------------------------------------------
            logits_ref[t] = jnp.dot(h1n.astype(bf16), wout_ref[...],
                                    preferred_element_type=f32) + bout
            attn_out_ref[t] = attn_new
            return h0n, h1n, attn_new

        init = (hid_init_ref[0], hid_init_ref[1], prev_init_ref[...])
        if T <= 16:
            # Small T: trace-time unroll (all indices static, full LLO view).
            carry = init
            for t in range(T):
                carry = step(t, carry)
        else:
            carry = jax.lax.fori_loop(0, T, step, init)
        h0f, h1f, _ = carry
        hid_out_ref[0] = h0f
        hid_out_ref[1] = h1f

    return kernel


# ----------------------------------------------------------------------------
# Wrappers.
# ----------------------------------------------------------------------------
def decoder_forward_fused(params, in_chars, hidden, encoder_output, src_len,
                          prev_attn):
    """Runs T chained decoder steps fused in a single pallas_call.

    in_chars: (T, B, V) per-step scores (top-1 is embedded, as in the module).
    Returns (logits (T,B,V), latest_hidden (L,B,H), attn_weights (T,B,W)).
    """
    f32, bf16 = jnp.float32, jnp.bfloat16
    P = jax.lax.Precision.HIGHEST
    T, B, V = in_chars.shape
    L, _, H = hidden.shape
    assert L == 2, "module has n_layers=2"
    Wd = encoder_output.shape[0]

    # ---- loop-invariant precompute in XLA (hoisted out of the kernel) ------
    emb = params["emb"].astype(f32)                       # (V, E)
    E = emb.shape[1]
    Wih0 = params["Wih0"].astype(f32)                     # (E + E*TR, 3H)
    Wih0_e, Wih0_c = Wih0[:E], Wih0[E:]
    Wcs = params["Wcs"].astype(f32)                       # (H, E*TR)
    bcs = params["bcs"].astype(f32)                       # (1, E*TR)

    # Exact folds: embedding + context_shrink into the GRU-0 input weights.
    W0e = jnp.dot(emb, Wih0_e, precision=P)               # (V, 3H)
    W0c = jnp.dot(Wcs, Wih0_c, precision=P)               # (H, 3H)
    b0_in = params["bih0"].astype(f32) + jnp.dot(bcs, Wih0_c, precision=P)

    # Hoisted top-1 + embedding lookup: per-step input-side gate bias.
    top1 = jnp.argmax(in_chars, axis=-1)                  # (T, B)
    emb_gates = (W0e[top1] + b0_in).astype(f32)           # (T, B, 3H)

    # Hoisted encoder content projection enc @ We + ba.
    enc_b = jnp.transpose(encoder_output, (1, 0, 2)).astype(f32)      # (B,Wd,H)
    encp = (jnp.einsum("bwh,hk->bwk", enc_b, params["We"].astype(f32),
                       precision=P)
            + params["ba"].astype(f32).reshape(1, 1, H)).astype(f32)

    # Host math from the module + additive length mask.
    enc_len = (src_len.astype(f32) * (Wd / src_len[0]) + 0.999
               ).astype(jnp.int32)
    negmask = jnp.where(jnp.arange(Wd)[None, :] < enc_len[:, None],
                        0.0, -1e30).astype(f32).reshape(B, Wd, 1)

    # Fused hidden-side weight: [h0|h1] @ [[Whh0,Wh_t,0],[0,Wh_b,Whh1]]
    #   -> [gh0 | hid_proj | gh1] in one matmul.
    Whh0 = params["Whh0"].astype(f32)
    Whh1 = params["Whh1"].astype(f32)
    Wh = params["Wh"].astype(f32)                         # (2H, H)
    zero = jnp.zeros((H, 3 * H), f32)
    w_h_all = jnp.concatenate(
        [jnp.concatenate([Whh0, Wh[:H], zero], axis=1),
         jnp.concatenate([zero, Wh[H:], Whh1], axis=1)], axis=0).astype(bf16)

    prev3 = prev_attn.astype(f32).reshape(B, Wd, 1)

    in_arrays = [
        emb_gates,                              # (T,B,3H)
        hidden.astype(f32),                     # (2,B,H)
        prev3,                                  # (B,Wd,1)
        enc_b,                                  # (B,Wd,H)
        encp,                                   # (B,Wd,H)
        negmask,                                # (B,Wd,1)
        w_h_all,                                # (2H,7H) bf16
        W0c.astype(bf16),                       # (H,3H)
        params["Wih1"].astype(bf16),            # (H,3H)
        params["Wout"].astype(bf16),            # (H,V)
        params["bhh0"].astype(f32),             # (1,3H)
        params["bih1"].astype(f32),             # (1,3H)
        params["bhh1"].astype(f32),             # (1,3H)
        params["bout"].astype(f32),             # (1,V)
        params["wloc"].astype(f32),             # (1,H)
        params["v"].astype(f32),                # (1,H)
    ]

    def const_map(ndim):
        return lambda i: (0,) * ndim

    in_specs = [pl.BlockSpec(a.shape, const_map(a.ndim)) for a in in_arrays]
    out_specs = [
        pl.BlockSpec((T, B, V), const_map(3)),
        pl.BlockSpec((L, B, H), const_map(3)),
        pl.BlockSpec((T, B, Wd, 1), const_map(4)),
    ]
    out_shape = (
        jax.ShapeDtypeStruct((T, B, V), jnp.float32),
        jax.ShapeDtypeStruct((L, B, H), jnp.float32),
        jax.ShapeDtypeStruct((T, B, Wd, 1), jnp.float32),
    )

    kernel = _make_kernel(T=T, H=H)
    grid_spec = pltpu.PrefetchScalarGridSpec(
        num_scalar_prefetch=0, grid=(1,),
        in_specs=in_specs, out_specs=out_specs)

    logits, latest_hidden, attn4 = pl.pallas_call(
        kernel,
        out_shape=out_shape,
        grid_spec=grid_spec,
        compiler_params=pltpu.CompilerParams(
            dimension_semantics=("arbitrary",)),
    )(*in_arrays)
    return logits, latest_hidden, attn4[..., 0]


def decoder_forward(params, in_char, hidden, encoder_output, src_len, prev_attn):
    """Single-step forward with the exact module signature/semantics."""
    logits, latest_hidden, attn = decoder_forward_fused(
        params, in_char[None], hidden, encoder_output, src_len, prev_attn)
    return logits[0], latest_hidden, attn[0]


# ----------------------------------------------------------------------------
# Pure-JAX reference (unfolded math, highest precision) for correctness check.
# ----------------------------------------------------------------------------
def _reference_step(params, in_char, hidden, encoder_output, enc_len, prev_attn):
    P = jax.lax.Precision.HIGHEST
    width = encoder_output.shape[0]
    L, B, H = hidden.shape
    hid_flat = jnp.concatenate([hidden[0], hidden[1]], axis=-1)
    hid_proj = jnp.dot(hid_flat, params["Wh"], precision=P)
    enc_b = jnp.transpose(encoder_output, (1, 0, 2))                 # (B, W, H)
    enc_proj = jnp.einsum("bwh,hk->bwk", enc_b, params["We"], precision=P)
    loc = prev_attn[:, :, None] * params["wloc"].reshape(1, 1, H)
    e = jnp.tanh(enc_proj + hid_proj[:, None, :] + loc +
                 params["ba"].reshape(1, 1, H))
    scores = jnp.einsum("bwh,h->bw", e, params["v"][0], precision=P)
    mask = jnp.arange(width)[None, :] < enc_len[:, None]
    scores = jnp.where(mask, scores, -1e30)
    attn = jax.nn.softmax(scores, axis=-1)

    context = jnp.einsum("bwh,bw->bh", enc_b, attn, precision=P)
    context = jnp.dot(context, params["Wcs"], precision=P) + params["bcs"]

    top1 = jnp.argmax(in_char, axis=1)
    embed_char = params["emb"][top1]
    in_dec = jnp.concatenate([embed_char, context], axis=1)

    def gru_cell(x, h, Wih, Whh, bih, bhh):
        gi = jnp.dot(x, Wih, precision=P) + bih
        gh = jnp.dot(h, Whh, precision=P) + bhh
        r = jax.nn.sigmoid(gi[:, :H] + gh[:, :H])
        z = jax.nn.sigmoid(gi[:, H:2 * H] + gh[:, H:2 * H])
        n = jnp.tanh(gi[:, 2 * H:] + r * gh[:, 2 * H:])
        return (1.0 - z) * n + z * h

    h0 = gru_cell(in_dec, hidden[0], params["Wih0"], params["Whh0"],
                  params["bih0"], params["bhh0"])
    h1 = gru_cell(h0, hidden[1], params["Wih1"], params["Whh1"],
                  params["bih1"], params["bhh1"])
    logits = jnp.dot(h1, params["Wout"], precision=P) + params["bout"]
    return logits, jnp.stack([h0, h1], axis=0), attn


def decoder_reference_rollout(params, in_chars, hidden, encoder_output, src_len,
                              prev_attn):
    T = in_chars.shape[0]
    Wd = encoder_output.shape[0]
    enc_len = (src_len.astype(jnp.float32) * (Wd / src_len[0]) + 0.999
               ).astype(jnp.int32)
    h, pa = hidden, prev_attn
    logits_all, attn_all = [], []
    for t in range(T):
        lg, h, a = _reference_step(params, in_chars[t], h, encoder_output,
                                   enc_len, pa)
        pa = a
        logits_all.append(lg)
        attn_all.append(a)
    return jnp.stack(logits_all), h, jnp.stack(attn_all)


# ----------------------------------------------------------------------------
if __name__ == "__main__":
    # hidden_size=32, embedding_size=16, vocab_size=16, n_layers=2,
    # tradeoff_context_embed=2, batch=2, encoder width=8, T=4 fused steps.
    B, H, E, V, W, L, TR, T = 2, 32, 16, 16, 8, 2, 2, 4

    key = jax.random.PRNGKey(0)
    keys = jax.random.split(key, 32)
    _it = iter(keys)

    def rnd(shape, scale=0.1):
        return (scale * jax.random.normal(next(_it), shape)).astype(jnp.float32)

    params = dict(
        # attention (injected module): W_h (L*H,H), W_e (H,H), bias, loc, score
        Wh=rnd((L * H, H)), We=rnd((H, H)), ba=rnd((1, H)), wloc=rnd((1, H)),
        v=rnd((1, H)),
        # context_shrink: hidden_size -> embed_size * tradeoff
        Wcs=rnd((H, E * TR)), bcs=rnd((1, E * TR)),
        # embedding (vocab_size, embed_size)
        emb=rnd((V, E)),
        # GRU layer 0: input = embed + embed*tradeoff ; stored as (in, 3H)
        Wih0=rnd((E + E * TR, 3 * H)), Whh0=rnd((H, 3 * H)),
        bih0=rnd((1, 3 * H)), bhh0=rnd((1, 3 * H)),
        # GRU layer 1
        Wih1=rnd((H, 3 * H)), Whh1=rnd((H, 3 * H)),
        bih1=rnd((1, 3 * H)), bhh1=rnd((1, 3 * H)),
        # output projection hidden -> vocab
        Wout=rnd((H, V)), bout=rnd((1, V)),
    )

    in_chars = rnd((T, B, V), 1.0)
    hidden = rnd((L, B, H), 1.0)
    encoder_output = rnd((W, B, H), 1.0)
    prev_attn = jax.nn.softmax(rnd((B, W), 1.0), axis=-1)
    src_len = jnp.array([W, W - 2], dtype=jnp.int32)   # enc_len >= 1 everywhere

    # Fused T-step decode (hidden / prev_attn chained inside the kernel).
    logits, latest_hidden, attn = decoder_forward_fused(
        params, in_chars, hidden, encoder_output, src_len, prev_attn)
    jax.block_until_ready((logits, latest_hidden, attn))

    ref_logits, ref_hidden, ref_attn = decoder_reference_rollout(
        params, in_chars, hidden, encoder_output, src_len, prev_attn)

    def check(name, got, want, atol=2e-2, rtol=2e-2):
        assert got.shape == want.shape, (name, got.shape, want.shape)
        err = float(jnp.max(jnp.abs(got - want)))
        assert jnp.allclose(got, want, atol=atol, rtol=rtol), (name, err)

    # Tolerance accommodates bf16 MXU inputs (f32 accumulation).
    check("logits", logits, ref_logits)
    check("hidden", latest_hidden, ref_hidden)
    check("attn", attn, ref_attn)

    # Single-step entry point (exact module signature) against step 0.
    lg1, hid1, at1 = decoder_forward(
        params, in_chars[0], hidden, encoder_output, src_len, prev_attn)
    jax.block_until_ready((lg1, hid1, at1))
    check("logits_step0", lg1, ref_logits[0])
    check("attn_step0", at1, ref_attn[0])

    print("KERNEL_OK")
</pallas_src>

<mosaic_0001>
module attributes {stable_mosaic.version = 11 : i64} {
  func.func @kernel(%arg0: i32, %arg1: memref<4x2x96xf32, #tpu.memory_space<vmem>>, %arg2: memref<2x2x32xf32, #tpu.memory_space<vmem>>, %arg3: memref<2x8x1xf32, #tpu.memory_space<vmem>>, %arg4: memref<2x8x32xf32, #tpu.memory_space<vmem>>, %arg5: memref<2x8x32xf32, #tpu.memory_space<vmem>>, %arg6: memref<2x8x1xf32, #tpu.memory_space<vmem>>, %arg7: memref<64x224xbf16, #tpu.memory_space<vmem>>, %arg8: memref<32x96xbf16, #tpu.memory_space<vmem>>, %arg9: memref<32x96xbf16, #tpu.memory_space<vmem>>, %arg10: memref<32x16xbf16, #tpu.memory_space<vmem>>, %arg11: memref<1x96xf32, #tpu.memory_space<vmem>>, %arg12: memref<1x96xf32, #tpu.memory_space<vmem>>, %arg13: memref<1x96xf32, #tpu.memory_space<vmem>>, %arg14: memref<1x16xf32, #tpu.memory_space<vmem>>, %arg15: memref<1x32xf32, #tpu.memory_space<vmem>>, %arg16: memref<1x32xf32, #tpu.memory_space<vmem>>, %arg17: memref<4x2x16xf32, #tpu.memory_space<vmem>>, %arg18: memref<2x2x32xf32, #tpu.memory_space<vmem>>, %arg19: memref<4x2x8x1xf32, #tpu.memory_space<vmem>>) attributes {dimension_semantics = [#tpu.dimension_semantics<arbitrary>], iteration_bounds = array<i64: 1>, scalar_prefetch = 0 : i64, scratch_operands = 0 : i64, tpu.core_type = #tpu.core_type<tc>, window_params = [{pipeline_mode = #tpu.pipeline_mode<synchronous>, transform_indices = @transform_0, window_bounds = array<i64: 4, 2, 96>}, {pipeline_mode = #tpu.pipeline_mode<synchronous>, transform_indices = @transform_1, window_bounds = array<i64: 2, 2, 32>}, {pipeline_mode = #tpu.pipeline_mode<synchronous>, transform_indices = @transform_2, window_bounds = array<i64: 2, 8, 1>}, {pipeline_mode = #tpu.pipeline_mode<synchronous>, transform_indices = @transform_3, window_bounds = array<i64: 2, 8, 32>}, {pipeline_mode = #tpu.pipeline_mode<synchronous>, transform_indices = @transform_4, window_bounds = array<i64: 2, 8, 32>}, {pipeline_mode = #tpu.pipeline_mode<synchronous>, transform_indices = @transform_5, window_bounds = array<i64: 2, 8, 1>}, {pipeline_mode = #tpu.pipeline_mode<synchronous>, transform_indices = @transform_6, window_bounds = array<i64: 64, 224>}, {pipeline_mode = #tpu.pipeline_mode<synchronous>, transform_indices = @transform_7, window_bounds = array<i64: 32, 96>}, {pipeline_mode = #tpu.pipeline_mode<synchronous>, transform_indices = @transform_8, window_bounds = array<i64: 32, 96>}, {pipeline_mode = #tpu.pipeline_mode<synchronous>, transform_indices = @transform_9, window_bounds = array<i64: 32, 16>}, {pipeline_mode = #tpu.pipeline_mode<synchronous>, transform_indices = @transform_10, window_bounds = array<i64: 1, 96>}, {pipeline_mode = #tpu.pipeline_mode<synchronous>, transform_indices = @transform_11, window_bounds = array<i64: 1, 96>}, {pipeline_mode = #tpu.pipeline_mode<synchronous>, transform_indices = @transform_12, window_bounds = array<i64: 1, 96>}, {pipeline_mode = #tpu.pipeline_mode<synchronous>, transform_indices = @transform_13, window_bounds = array<i64: 1, 16>}, {pipeline_mode = #tpu.pipeline_mode<synchronous>, transform_indices = @transform_14, window_bounds = array<i64: 1, 32>}, {pipeline_mode = #tpu.pipeline_mode<synchronous>, transform_indices = @transform_15, window_bounds = array<i64: 1, 32>}, {pipeline_mode = #tpu.pipeline_mode<synchronous>, transform_indices = @transform_16, window_bounds = array<i64: 4, 2, 16>}, {pipeline_mode = #tpu.pipeline_mode<synchronous>, transform_indices = @transform_17, window_bounds = array<i64: 2, 2, 32>}, {pipeline_mode = #tpu.pipeline_mode<synchronous>, transform_indices = @transform_18, window_bounds = array<i64: 4, 2, 8, 1>}]} {
    %c0 = arith.constant 0 : index
    %c0_0 = arith.constant 0 : index
    %c0_1 = arith.constant 0 : index
    %0 = vector.load %arg4[%c0, %c0_0, %c0_1] : memref<2x8x32xf32, #tpu.memory_space<vmem>>, vector<2x8x32xf32>
    %c0_2 = arith.constant 0 : index
    %c0_3 = arith.constant 0 : index
    %c0_4 = arith.constant 0 : index
    %1 = vector.load %arg5[%c0_2, %c0_3, %c0_4] : memref<2x8x32xf32, #tpu.memory_space<vmem>>, vector<2x8x32xf32>
    %c0_5 = arith.constant 0 : index
    %c0_6 = arith.constant 0 : index
    %c0_7 = arith.constant 0 : index
    %2 = vector.load %arg6[%c0_5, %c0_6, %c0_7] : memref<2x8x1xf32, #tpu.memory_space<vmem>>, vector<2x8x1xf32>
    %c0_8 = arith.constant 0 : index
    %c0_9 = arith.constant 0 : index
    %3 = vector.load %arg15[%c0_8, %c0_9] : memref<1x32xf32, #tpu.memory_space<vmem>>, vector<1x32xf32>
    %4 = vector.shape_cast %3 : vector<1x32xf32> to vector<1x1x32xf32>
    %c0_10 = arith.constant 0 : index
    %c0_11 = arith.constant 0 : index
    %5 = vector.load %arg16[%c0_10, %c0_11] : memref<1x32xf32, #tpu.memory_space<vmem>>, vector<1x32xf32>
    %6 = vector.shape_cast %5 : vector<1x32xf32> to vector<1x1x32xf32>
    %c0_12 = arith.constant 0 : index
    %c0_13 = arith.constant 0 : index
    %7 = vector.load %arg11[%c0_12, %c0_13] : memref<1x96xf32, #tpu.memory_space<vmem>>, vector<1x96xf32>
    %c0_14 = arith.constant 0 : index
    %c0_15 = arith.constant 0 : index
    %8 = vector.load %arg12[%c0_14, %c0_15] : memref<1x96xf32, #tpu.memory_space<vmem>>, vector<1x96xf32>
    %c0_16 = arith.constant 0 : index
    %c0_17 = arith.constant 0 : index
    %9 = vector.load %arg13[%c0_16, %c0_17] : memref<1x96xf32, #tpu.memory_space<vmem>>, vector<1x96xf32>
    %c0_18 = arith.constant 0 : index
    %c0_19 = arith.constant 0 : index
    %10 = vector.load %arg14[%c0_18, %c0_19] : memref<1x16xf32, #tpu.memory_space<vmem>>, vector<1x16xf32>
    %c0_20 = arith.constant 0 : index
    %c0_21 = arith.constant 0 : index
    %c0_22 = arith.constant 0 : index
    %11 = vector.load %arg2[%c0_20, %c0_21, %c0_22] : memref<2x2x32xf32, #tpu.memory_space<vmem>>, vector<1x2x32xf32>
    %12 = vector.shape_cast %11 : vector<1x2x32xf32> to vector<2x32xf32>
    %c1 = arith.constant 1 : index
    %c0_23 = arith.constant 0 : index
    %c0_24 = arith.constant 0 : index
    %13 = vector.load %arg2[%c1, %c0_23, %c0_24] : memref<2x2x32xf32, #tpu.memory_space<vmem>>, vector<1x2x32xf32>
    %14 = vector.shape_cast %13 : vector<1x2x32xf32> to vector<2x32xf32>
    %c0_25 = arith.constant 0 : index
    %c0_26 = arith.constant 0 : index
    %c0_27 = arith.constant 0 : index
    %15 = vector.load %arg3[%c0_25, %c0_26, %c0_27] : memref<2x8x1xf32, #tpu.memory_space<vmem>>, vector<2x8x1xf32>
    %16 = tpu.concatenate %12, %14 in 1 : vector<2x32xf32>, vector<2x32xf32> -> vector<2x64xf32>
    %17 = arith.truncf %16 : vector<2x64xf32> to vector<2x64xbf16>
    %c0_28 = arith.constant 0 : index
    %c0_29 = arith.constant 0 : index
    %18 = vector.load %arg7[%c0_28, %c0_29] : memref<64x224xbf16, #tpu.memory_space<vmem>>, vector<64x224xbf16>
    %cst = arith.constant dense<0.000000e+00> : vector<2x224xf32>
    %19 = tpu.matmul %17, %18, %cst {dimension_numbers = #tpu.dot_dimension_numbers<[1], [0], [0], [1], [0, 0, 1, 1], [], []>} : vector<2x64xbf16>, vector<64x224xbf16>, vector<2x224xf32> -> vector<2x224xf32>
    %20 = vector.extract_strided_slice %19 {offsets = [0, 0], sizes = [2, 96], strides = [1, 1]} : vector<2x224xf32> to vector<2x96xf32>
    %21 = vector.broadcast %7 : vector<1x96xf32> to vector<2x96xf32>
    %22 = arith.addf %20, %21 : vector<2x96xf32>
    %23 = vector.extract_strided_slice %19 {offsets = [0, 96], sizes = [2, 32], strides = [1, 1]} : vector<2x224xf32> to vector<2x32xf32>
    %24 = vector.extract_strided_slice %19 {offsets = [0, 128], sizes = [2, 96], strides = [1, 1]} : vector<2x224xf32> to vector<2x96xf32>
    %25 = vector.broadcast %9 : vector<1x96xf32> to vector<2x96xf32>
    %26 = arith.addf %24, %25 : vector<2x96xf32>
    %27 = vector.shape_cast %23 : vector<2x32xf32> to vector<2x1x32xf32>
    %28 = vector.broadcast %27 : vector<2x1x32xf32> to vector<2x8x32xf32>
    %29 = arith.addf %1, %28 : vector<2x8x32xf32>
    %30 = vector.broadcast %15 : vector<2x8x1xf32> to vector<2x8x32xf32>
    %31 = vector.broadcast %4 : vector<1x1x32xf32> to vector<2x8x32xf32>
    %32 = arith.mulf %30, %31 : vector<2x8x32xf32>
    %33 = arith.addf %29, %32 : vector<2x8x32xf32>
    %34 = math.tanh %33 : vector<2x8x32xf32>
    %35 = vector.broadcast %6 : vector<1x1x32xf32> to vector<2x8x32xf32>
    %36 = arith.mulf %34, %35 : vector<2x8x32xf32>
    %cst_30 = arith.constant dense<0.000000e+00> : vector<2x8xf32>
    %37 = vector.multi_reduction <add>, %36, %cst_30 [2] : vector<2x8x32xf32> to vector<2x8xf32>
    %38 = vector.shape_cast %37 : vector<2x8xf32> to vector<2x8x1xf32>
    %39 = arith.addf %38, %2 : vector<2x8x1xf32>
    %cst_31 = arith.constant dense<0xFF800000> : vector<2x1xf32>
    %40 = vector.multi_reduction <maximumf>, %39, %cst_31 [1] : vector<2x8x1xf32> to vector<2x1xf32>
    %41 = vector.shape_cast %40 : vector<2x1xf32> to vector<2x1x1xf32>
    %42 = vector.broadcast %41 : vector<2x1x1xf32> to vector<2x8x1xf32>
    %43 = arith.subf %39, %42 : vector<2x8x1xf32>
    %44 = math.exp %43 : vector<2x8x1xf32>
    %cst_32 = arith.constant dense<0.000000e+00> : vector<2x1xf32>
    %45 = vector.multi_reduction <add>, %44, %cst_32 [1] : vector<2x8x1xf32> to vector<2x1xf32>
    %46 = vector.shape_cast %45 : vector<2x1xf32> to vector<2x1x1xf32>
    %47 = vector.broadcast %46 : vector<2x1x1xf32> to vector<2x8x1xf32>
    %48 = arith.divf %44, %47 : vector<2x8x1xf32>
    %49 = vector.broadcast %48 : vector<2x8x1xf32> to vector<2x8x32xf32>
    %50 = arith.mulf %49, %0 : vector<2x8x32xf32>
    %cst_33 = arith.constant dense<0.000000e+00> : vector<2x32xf32>
    %51 = vector.multi_reduction <add>, %50, %cst_33 [1] : vector<2x8x32xf32> to vector<2x32xf32>
    %c0_34 = arith.constant 0 : index
    %c0_35 = arith.constant 0 : index
    %c0_36 = arith.constant 0 : index
    %52 = vector.load %arg1[%c0_34, %c0_35, %c0_36] : memref<4x2x96xf32, #tpu.memory_space<vmem>>, vector<1x2x96xf32>
    %53 = vector.shape_cast %52 : vector<1x2x96xf32> to vector<2x96xf32>
    %54 = arith.truncf %51 : vector<2x32xf32> to vector<2x32xbf16>
    %c0_37 = arith.constant 0 : index
    %c0_38 = arith.constant 0 : index
    %55 = vector.load %arg8[%c0_37, %c0_38] : memref<32x96xbf16, #tpu.memory_space<vmem>>, vector<32x96xbf16>
    %cst_39 = arith.constant dense<0.000000e+00> : vector<2x96xf32>
    %56 = tpu.matmul %54, %55, %cst_39 {dimension_numbers = #tpu.dot_dimension_numbers<[1], [0], [0], [1], [0, 0, 1, 1], [], []>} : vector<2x32xbf16>, vector<32x96xbf16>, vector<2x96xf32> -> vector<2x96xf32>
    %57 = arith.addf %53, %56 : vector<2x96xf32>
    %58 = vector.extract_strided_slice %57 {offsets = [0, 0], sizes = [2, 32], strides = [1, 1]} : vector<2x96xf32> to vector<2x32xf32>
    %59 = vector.extract_strided_slice %22 {offsets = [0, 0], sizes = [2, 32], strides = [1, 1]} : vector<2x96xf32> to vector<2x32xf32>
    %60 = arith.addf %58, %59 : vector<2x32xf32>
    %61 = arith.negf %60 : vector<2x32xf32>
    %62 = math.exp %61 : vector<2x32xf32>
    %cst_40 = arith.constant 1.000000e+00 : f32
    %63 = vector.broadcast %cst_40 : f32 to vector<2x32xf32>
    %64 = arith.addf %63, %62 : vector<2x32xf32>
    %65 = arith.divf %63, %64 : vector<2x32xf32>
    %66 = vector.extract_strided_slice %57 {offsets = [0, 32], sizes = [2, 32], strides = [1, 1]} : vector<2x96xf32> to vector<2x32xf32>
    %67 = vector.extract_strided_slice %22 {offsets = [0, 32], sizes = [2, 32], strides = [1, 1]} : vector<2x96xf32> to vector<2x32xf32>
    %68 = arith.addf %66, %67 : vector<2x32xf32>
    %69 = arith.negf %68 : vector<2x32xf32>
    %70 = math.exp %69 : vector<2x32xf32>
    %cst_41 = arith.constant 1.000000e+00 : f32
    %71 = vector.broadcast %cst_41 : f32 to vector<2x32xf32>
    %72 = arith.addf %71, %70 : vector<2x32xf32>
    %73 = arith.divf %71, %72 : vector<2x32xf32>
    %74 = vector.extract_strided_slice %57 {offsets = [0, 64], sizes = [2, 32], strides = [1, 1]} : vector<2x96xf32> to vector<2x32xf32>
    %75 = vector.extract_strided_slice %22 {offsets = [0, 64], sizes = [2, 32], strides = [1, 1]} : vector<2x96xf32> to vector<2x32xf32>
    %76 = arith.mulf %65, %75 : vector<2x32xf32>
    %77 = arith.addf %74, %76 : vector<2x32xf32>
    %78 = math.tanh %77 : vector<2x32xf32>
    %cst_42 = arith.constant 1.000000e+00 : f32
    %79 = vector.broadcast %cst_42 : f32 to vector<2x32xf32>
    %80 = arith.subf %79, %73 : vector<2x32xf32>
    %81 = arith.mulf %80, %78 : vector<2x32xf32>
    %82 = arith.mulf %73, %12 : vector<2x32xf32>
    %83 = arith.addf %81, %82 : vector<2x32xf32>
    %84 = arith.truncf %83 : vector<2x32xf32> to vector<2x32xbf16>
    %c0_43 = arith.constant 0 : index
    %c0_44 = arith.constant 0 : index
    %85 = vector.load %arg9[%c0_43, %c0_44] : memref<32x96xbf16, #tpu.memory_space<vmem>>, vector<32x96xbf16>
    %cst_45 = arith.constant dense<0.000000e+00> : vector<2x96xf32>
    %86 = tpu.matmul %84, %85, %cst_45 {dimension_numbers = #tpu.dot_dimension_numbers<[1], [0], [0], [1], [0, 0, 1, 1], [], []>} : vector<2x32xbf16>, vector<32x96xbf16>, vector<2x96xf32> -> vector<2x96xf32>
    %87 = vector.broadcast %8 : vector<1x96xf32> to vector<2x96xf32>
    %88 = arith.addf %86, %87 : vector<2x96xf32>
    %89 = vector.extract_strided_slice %88 {offsets = [0, 0], sizes = [2, 32], strides = [1, 1]} : vector<2x96xf32> to vector<2x32xf32>
    %90 = vector.extract_strided_slice %26 {offsets = [0, 0], sizes = [2, 32], strides = [1, 1]} : vector<2x96xf32> to vector<2x32xf32>
    %91 = arith.addf %89, %90 : vector<2x32xf32>
    %92 = arith.negf %91 : vector<2x32xf32>
    %93 = math.exp %92 : vector<2x32xf32>
    %cst_46 = arith.constant 1.000000e+00 : f32
    %94 = vector.broadcast %cst_46 : f32 to vector<2x32xf32>
    %95 = arith.addf %94, %93 : vector<2x32xf32>
    %96 = arith.divf %94, %95 : vector<2x32xf32>
    %97 = vector.extract_strided_slice %88 {offsets = [0, 32], sizes = [2, 32], strides = [1, 1]} : vector<2x96xf32> to vector<2x32xf32>
    %98 = vector.extract_strided_slice %26 {offsets = [0, 32], sizes = [2, 32], strides = [1, 1]} : vector<2x96xf32> to vector<2x32xf32>
    %99 = arith.addf %97, %98 : vector<2x32xf32>
    %100 = arith.negf %99 : vector<2x32xf32>
    %101 = math.exp %100 : vector<2x32xf32>
    %cst_47 = arith.constant 1.000000e+00 : f32
    %102 = vector.broadcast %cst_47 : f32 to vector<2x32xf32>
    %103 = arith.addf %102, %101 : vector<2x32xf32>
    %104 = arith.divf %102, %103 : vector<2x32xf32>
    %105 = vector.extract_strided_slice %88 {offsets = [0, 64], sizes = [2, 32], strides = [1, 1]} : vector<2x96xf32> to vector<2x32xf32>
    %106 = vector.extract_strided_slice %26 {offsets = [0, 64], sizes = [2, 32], strides = [1, 1]} : vector<2x96xf32> to vector<2x32xf32>
    %107 = arith.mulf %96, %106 : vector<2x32xf32>
    %108 = arith.addf %105, %107 : vector<2x32xf32>
    %109 = math.tanh %108 : vector<2x32xf32>
    %cst_48 = arith.constant 1.000000e+00 : f32
    %110 = vector.broadcast %cst_48 : f32 to vector<2x32xf32>
    %111 = arith.subf %110, %104 : vector<2x32xf32>
    %112 = arith.mulf %111, %109 : vector<2x32xf32>
    %113 = arith.mulf %104, %14 : vector<2x32xf32>
    %114 = arith.addf %112, %113 : vector<2x32xf32>
    %115 = arith.truncf %114 : vector<2x32xf32> to vector<2x32xbf16>
    %c0_49 = arith.constant 0 : index
    %c0_50 = arith.constant 0 : index
    %116 = vector.load %arg10[%c0_49, %c0_50] : memref<32x16xbf16, #tpu.memory_space<vmem>>, vector<32x16xbf16>
    %cst_51 = arith.constant dense<0.000000e+00> : vector<2x16xf32>
    %117 = tpu.matmul %115, %116, %cst_51 {dimension_numbers = #tpu.dot_dimension_numbers<[1], [0], [0], [1], [0, 0, 1, 1], [], []>} : vector<2x32xbf16>, vector<32x16xbf16>, vector<2x16xf32> -> vector<2x16xf32>
    %118 = vector.broadcast %10 : vector<1x16xf32> to vector<2x16xf32>
    %119 = arith.addf %117, %118 : vector<2x16xf32>
    %c0_52 = arith.constant 0 : index
    %c0_53 = arith.constant 0 : index
    %c0_54 = arith.constant 0 : index
    %120 = vector.load %arg17[%c0_52, %c0_53, %c0_54] : memref<4x2x16xf32, #tpu.memory_space<vmem>>, vector<1x2x16xf32>
    %121 = vector.shape_cast %120 : vector<1x2x16xf32> to vector<2x16xf32>
    %122 = vector.shape_cast %119 : vector<2x16xf32> to vector<1x2x16xf32>
    tpu.vector_store %arg17[%c0_52, %c0_53, %c0_54], %122 {strides = array<i32>} : memref<4x2x16xf32, #tpu.memory_space<vmem>>, vector<1x2x16xf32>,
    %c0_55 = arith.constant 0 : index
    %c0_56 = arith.constant 0 : index
    %c0_57 = arith.constant 0 : index
    %c0_58 = arith.constant 0 : index
    %123 = vector.load %arg19[%c0_55, %c0_56, %c0_57, %c0_58] : memref<4x2x8x1xf32, #tpu.memory_space<vmem>>, vector<1x2x8x1xf32>
    %124 = vector.shape_cast %123 : vector<1x2x8x1xf32> to vector<2x8x1xf32>
    %125 = vector.shape_cast %48 : vector<2x8x1xf32> to vector<1x2x8x1xf32>
    tpu.vector_store %arg19[%c0_55, %c0_56, %c0_57, %c0_58], %125 {strides = array<i32>} : memref<4x2x8x1xf32, #tpu.memory_space<vmem>>, vector<1x2x8x1xf32>,
    %126 = tpu.concatenate %83, %114 in 1 : vector<2x32xf32>, vector<2x32xf32> -> vector<2x64xf32>
    %127 = arith.truncf %126 : vector<2x64xf32> to vector<2x64xbf16>
    %c0_59 = arith.constant 0 : index
    %c0_60 = arith.constant 0 : index
    %128 = vector.load %arg7[%c0_59, %c0_60] : memref<64x224xbf16, #tpu.memory_space<vmem>>, vector<64x224xbf16>
    %cst_61 = arith.constant dense<0.000000e+00> : vector<2x224xf32>
    %129 = tpu.matmul %127, %128, %cst_61 {dimension_numbers = #tpu.dot_dimension_numbers<[1], [0], [0], [1], [0, 0, 1, 1], [], []>} : vector<2x64xbf16>, vector<64x224xbf16>, vector<2x224xf32> -> vector<2x224xf32>
    %130 = vector.extract_strided_slice %129 {offsets = [0, 0], sizes = [2, 96], strides = [1, 1]} : vector<2x224xf32> to vector<2x96xf32>
    %131 = vector.broadcast %7 : vector<1x96xf32> to vector<2x96xf32>
    %132 = arith.addf %130, %131 : vector<2x96xf32>
    %133 = vector.extract_strided_slice %129 {offsets = [0, 96], sizes = [2, 32], strides = [1, 1]} : vector<2x224xf32> to vector<2x32xf32>
    %134 = vector.extract_strided_slice %129 {offsets = [0, 128], sizes = [2, 96], strides = [1, 1]} : vector<2x224xf32> to vector<2x96xf32>
    %135 = vector.broadcast %9 : vector<1x96xf32> to vector<2x96xf32>
    %136 = arith.addf %134, %135 : vector<2x96xf32>
    %137 = vector.shape_cast %133 : vector<2x32xf32> to vector<2x1x32xf32>
    %138 = vector.broadcast %137 : vector<2x1x32xf32> to vector<2x8x32xf32>
    %139 = arith.addf %1, %138 : vector<2x8x32xf32>
    %140 = vector.broadcast %48 : vector<2x8x1xf32> to vector<2x8x32xf32>
    %141 = vector.broadcast %4 : vector<1x1x32xf32> to vector<2x8x32xf32>
    %142 = arith.mulf %140, %141 : vector<2x8x32xf32>
    %143 = arith.addf %139, %142 : vector<2x8x32xf32>
    %144 = math.tanh %143 : vector<2x8x32xf32>
    %145 = vector.broadcast %6 : vector<1x1x32xf32> to vector<2x8x32xf32>
    %146 = arith.mulf %144, %145 : vector<2x8x32xf32>
    %cst_62 = arith.constant dense<0.000000e+00> : vector<2x8xf32>
    %147 = vector.multi_reduction <add>, %146, %cst_62 [2] : vector<2x8x32xf32> to vector<2x8xf32>
    %148 = vector.shape_cast %147 : vector<2x8xf32> to vector<2x8x1xf32>
    %149 = arith.addf %148, %2 : vector<2x8x1xf32>
    %cst_63 = arith.constant dense<0xFF800000> : vector<2x1xf32>
    %150 = vector.multi_reduction <maximumf>, %149, %cst_63 [1] : vector<2x8x1xf32> to vector<2x1xf32>
    %151 = vector.shape_cast %150 : vector<2x1xf32> to vector<2x1x1xf32>
    %152 = vector.broadcast %151 : vector<2x1x1xf32> to vector<2x8x1xf32>
    %153 = arith.subf %149, %152 : vector<2x8x1xf32>
    %154 = math.exp %153 : vector<2x8x1xf32>
    %cst_64 = arith.constant dense<0.000000e+00> : vector<2x1xf32>
    %155 = vector.multi_reduction <add>, %154, %cst_64 [1] : vector<2x8x1xf32> to vector<2x1xf32>
    %156 = vector.shape_cast %155 : vector<2x1xf32> to vector<2x1x1xf32>
    %157 = vector.broadcast %156 : vector<2x1x1xf32> to vector<2x8x1xf32>
    %158 = arith.divf %154, %157 : vector<2x8x1xf32>
    %159 = vector.broadcast %158 : vector<2x8x1xf32> to vector<2x8x32xf32>
    %160 = arith.mulf %159, %0 : vector<2x8x32xf32>
    %cst_65 = arith.constant dense<0.000000e+00> : vector<2x32xf32>
    %161 = vector.multi_reduction <add>, %160, %cst_65 [1] : vector<2x8x32xf32> to vector<2x32xf32>
    %c1_66 = arith.constant 1 : index
    %c0_67 = arith.constant 0 : index
    %c0_68 = arith.constant 0 : index
    %162 = vector.load %arg1[%c1_66, %c0_67, %c0_68] : memref<4x2x96xf32, #tpu.memory_space<vmem>>, vector<1x2x96xf32>
    %163 = vector.shape_cast %162 : vector<1x2x96xf32> to vector<2x96xf32>
    %164 = arith.truncf %161 : vector<2x32xf32> to vector<2x32xbf16>
    %c0_69 = arith.constant 0 : index
    %c0_70 = arith.constant 0 : index
    %165 = vector.load %arg8[%c0_69, %c0_70] : memref<32x96xbf16, #tpu.memory_space<vmem>>, vector<32x96xbf16>
    %cst_71 = arith.constant dense<0.000000e+00> : vector<2x96xf32>
    %166 = tpu.matmul %164, %165, %cst_71 {dimension_numbers = #tpu.dot_dimension_numbers<[1], [0], [0], [1], [0, 0, 1, 1], [], []>} : vector<2x32xbf16>, vector<32x96xbf16>, vector<2x96xf32> -> vector<2x96xf32>
    %167 = arith.addf %163, %166 : vector<2x96xf32>
    %168 = vector.extract_strided_slice %167 {offsets = [0, 0], sizes = [2, 32], strides = [1, 1]} : vector<2x96xf32> to vector<2x32xf32>
    %169 = vector.extract_strided_slice %132 {offsets = [0, 0], sizes = [2, 32], strides = [1, 1]} : vector<2x96xf32> to vector<2x32xf32>
    %170 = arith.addf %168, %169 : vector<2x32xf32>
    %171 = arith.negf %170 : vector<2x32xf32>
    %172 = math.exp %171 : vector<2x32xf32>
    %cst_72 = arith.constant 1.000000e+00 : f32
    %173 = vector.broadcast %cst_72 : f32 to vector<2x32xf32>
    %174 = arith.addf %173, %172 : vector<2x32xf32>
    %175 = arith.divf %173, %174 : vector<2x32xf32>
    %176 = vector.extract_strided_slice %167 {offsets = [0, 32], sizes = [2, 32], strides = [1, 1]} : vector<2x96xf32> to vector<2x32xf32>
    %177 = vector.extract_strided_slice %132 {offsets = [0, 32], sizes = [2, 32], strides = [1, 1]} : vector<2x96xf32> to vector<2x32xf32>
    %178 = arith.addf %176, %177 : vector<2x32xf32>
    %179 = arith.negf %178 : vector<2x32xf32>
    %180 = math.exp %179 : vector<2x32xf32>
    %cst_73 = arith.constant 1.000000e+00 : f32
    %181 = vector.broadcast %cst_73 : f32 to vector<2x32xf32>
    %182 = arith.addf %181, %180 : vector<2x32xf32>
    %183 = arith.divf %181, %182 : vector<2x32xf32>
    %184 = vector.extract_strided_slice %167 {offsets = [0, 64], sizes = [2, 32], strides = [1, 1]} : vector<2x96xf32> to vector<2x32xf32>
    %185 = vector.extract_strided_slice %132 {offsets = [0, 64], sizes = [2, 32], strides = [1, 1]} : vector<2x96xf32> to vector<2x32xf32>
    %186 = arith.mulf %175, %185 : vector<2x32xf32>
    %187 = arith.addf %184, %186 : vector<2x32xf32>
    %188 = math.tanh %187 : vector<2x32xf32>
    %cst_74 = arith.constant 1.000000e+00 : f32
    %189 = vector.broadcast %cst_74 : f32 to vector<2x32xf32>
    %190 = arith.subf %189, %183 : vector<2x32xf32>
    %191 = arith.mulf %190, %188 : vector<2x32xf32>
    %192 = arith.mulf %183, %83 : vector<2x32xf32>
    %193 = arith.addf %191, %192 : vector<2x32xf32>
    %194 = arith.truncf %193 : vector<2x32xf32> to vector<2x32xbf16>
    %c0_75 = arith.constant 0 : index
    %c0_76 = arith.constant 0 : index
    %195 = vector.load %arg9[%c0_75, %c0_76] : memref<32x96xbf16, #tpu.memory_space<vmem>>, vector<32x96xbf16>
    %cst_77 = arith.constant dense<0.000000e+00> : vector<2x96xf32>
    %196 = tpu.matmul %194, %195, %cst_77 {dimension_numbers = #tpu.dot_dimension_numbers<[1], [0], [0], [1], [0, 0, 1, 1], [], []>} : vector<2x32xbf16>, vector<32x96xbf16>, vector<2x96xf32> -> vector<2x96xf32>
    %197 = vector.broadcast %8 : vector<1x96xf32> to vector<2x96xf32>
    %198 = arith.addf %196, %197 : vector<2x96xf32>
    %199 = vector.extract_strided_slice %198 {offsets = [0, 0], sizes = [2, 32], strides = [1, 1]} : vector<2x96xf32> to vector<2x32xf32>
    %200 = vector.extract_strided_slice %136 {offsets = [0, 0], sizes = [2, 32], strides = [1, 1]} : vector<2x96xf32> to vector<2x32xf32>
    %201 = arith.addf %199, %200 : vector<2x32xf32>
    %202 = arith.negf %201 : vector<2x32xf32>
    %203 = math.exp %202 : vector<2x32xf32>
    %cst_78 = arith.constant 1.000000e+00 : f32
    %204 = vector.broadcast %cst_78 : f32 to vector<2x32xf32>
    %205 = arith.addf %204, %203 : vector<2x32xf32>
    %206 = arith.divf %204, %205 : vector<2x32xf32>
    %207 = vector.extract_strided_slice %198 {offsets = [0, 32], sizes = [2, 32], strides = [1, 1]} : vector<2x96xf32> to vector<2x32xf32>
    %208 = vector.extract_strided_slice %136 {offsets = [0, 32], sizes = [2, 32], strides = [1, 1]} : vector<2x96xf32> to vector<2x32xf32>
    %209 = arith.addf %207, %208 : vector<2x32xf32>
    %210 = arith.negf %209 : vector<2x32xf32>
    %211 = math.exp %210 : vector<2x32xf32>
    %cst_79 = arith.constant 1.000000e+00 : f32
    %212 = vector.broadcast %cst_79 : f32 to vector<2x32xf32>
    %213 = arith.addf %212, %211 : vector<2x32xf32>
    %214 = arith.divf %212, %213 : vector<2x32xf32>
    %215 = vector.extract_strided_slice %198 {offsets = [0, 64], sizes = [2, 32], strides = [1, 1]} : vector<2x96xf32> to vector<2x32xf32>
    %216 = vector.extract_strided_slice %136 {offsets = [0, 64], sizes = [2, 32], strides = [1, 1]} : vector<2x96xf32> to vector<2x32xf32>
    %217 = arith.mulf %206, %216 : vector<2x32xf32>
    %218 = arith.addf %215, %217 : vector<2x32xf32>
    %219 = math.tanh %218 : vector<2x32xf32>
    %cst_80 = arith.constant 1.000000e+00 : f32
    %220 = vector.broadcast %cst_80 : f32 to vector<2x32xf32>
    %221 = arith.subf %220, %214 : vector<2x32xf32>
    %222 = arith.mulf %221, %219 : vector<2x32xf32>
    %223 = arith.mulf %214, %114 : vector<2x32xf32>
    %224 = arith.addf %222, %223 : vector<2x32xf32>
    %225 = arith.truncf %224 : vector<2x32xf32> to vector<2x32xbf16>
    %c0_81 = arith.constant 0 : index
    %c0_82 = arith.constant 0 : index
    %226 = vector.load %arg10[%c0_81, %c0_82] : memref<32x16xbf16, #tpu.memory_space<vmem>>, vector<32x16xbf16>
    %cst_83 = arith.constant dense<0.000000e+00> : vector<2x16xf32>
    %227 = tpu.matmul %225, %226, %cst_83 {dimension_numbers = #tpu.dot_dimension_numbers<[1], [0], [0], [1], [0, 0, 1, 1], [], []>} : vector<2x32xbf16>, vector<32x16xbf16>, vector<2x16xf32> -> vector<2x16xf32>
    %228 = vector.broadcast %10 : vector<1x16xf32> to vector<2x16xf32>
    %229 = arith.addf %227, %228 : vector<2x16xf32>
    %c1_84 = arith.constant 1 : index
    %c0_85 = arith.constant 0 : index
    %c0_86 = arith.constant 0 : index
    %230 = vector.load %arg17[%c1_84, %c0_85, %c0_86] : memref<4x2x16xf32, #tpu.memory_space<vmem>>, vector<1x2x16xf32>
    %231 = vector.shape_cast %230 : vector<1x2x16xf32> to vector<2x16xf32>
    %232 = vector.shape_cast %229 : vector<2x16xf32> to vector<1x2x16xf32>
    tpu.vector_store %arg17[%c1_84, %c0_85, %c0_86], %232 {strides = array<i32>} : memref<4x2x16xf32, #tpu.memory_space<vmem>>, vector<1x2x16xf32>,
    %c1_87 = arith.constant 1 : index
    %c0_88 = arith.constant 0 : index
    %c0_89 = arith.constant 0 : index
    %c0_90 = arith.constant 0 : index
    %233 = vector.load %arg19[%c1_87, %c0_88, %c0_89, %c0_90] : memref<4x2x8x1xf32, #tpu.memory_space<vmem>>, vector<1x2x8x1xf32>
    %234 = vector.shape_cast %233 : vector<1x2x8x1xf32> to vector<2x8x1xf32>
    %235 = vector.shape_cast %158 : vector<2x8x1xf32> to vector<1x2x8x1xf32>
    tpu.vector_store %arg19[%c1_87, %c0_88, %c0_89, %c0_90], %235 {strides = array<i32>} : memref<4x2x8x1xf32, #tpu.memory_space<vmem>>, vector<1x2x8x1xf32>,
    %236 = tpu.concatenate %193, %224 in 1 : vector<2x32xf32>, vector<2x32xf32> -> vector<2x64xf32>
    %237 = arith.truncf %236 : vector<2x64xf32> to vector<2x64xbf16>
    %c0_91 = arith.constant 0 : index
    %c0_92 = arith.constant 0 : index
    %238 = vector.load %arg7[%c0_91, %c0_92] : memref<64x224xbf16, #tpu.memory_space<vmem>>, vector<64x224xbf16>
    %cst_93 = arith.constant dense<0.000000e+00> : vector<2x224xf32>
    %239 = tpu.matmul %237, %238, %cst_93 {dimension_numbers = #tpu.dot_dimension_numbers<[1], [0], [0], [1], [0, 0, 1, 1], [], []>} : vector<2x64xbf16>, vector<64x224xbf16>, vector<2x224xf32> -> vector<2x224xf32>
    %240 = vector.extract_strided_slice %239 {offsets = [0, 0], sizes = [2, 96], strides = [1, 1]} : vector<2x224xf32> to vector<2x96xf32>
    %241 = vector.broadcast %7 : vector<1x96xf32> to vector<2x96xf32>
    %242 = arith.addf %240, %241 : vector<2x96xf32>
    %243 = vector.extract_strided_slice %239 {offsets = [0, 96], sizes = [2, 32], strides = [1, 1]} : vector<2x224xf32> to vector<2x32xf32>
    %244 = vector.extract_strided_slice %239 {offsets = [0, 128], sizes = [2, 96], strides = [1, 1]} : vector<2x224xf32> to vector<2x96xf32>
    %245 = vector.broadcast %9 : vector<1x96xf32> to vector<2x96xf32>
    %246 = arith.addf %244, %245 : vector<2x96xf32>
    %247 = vector.shape_cast %243 : vector<2x32xf32> to vector<2x1x32xf32>
    %248 = vector.broadcast %247 : vector<2x1x32xf32> to vector<2x8x32xf32>
    %249 = arith.addf %1, %248 : vector<2x8x32xf32>
    %250 = vector.broadcast %158 : vector<2x8x1xf32> to vector<2x8x32xf32>
    %251 = vector.broadcast %4 : vector<1x1x32xf32> to vector<2x8x32xf32>
    %252 = arith.mulf %250, %251 : vector<2x8x32xf32>
    %253 = arith.addf %249, %252 : vector<2x8x32xf32>
    %254 = math.tanh %253 : vector<2x8x32xf32>
    %255 = vector.broadcast %6 : vector<1x1x32xf32> to vector<2x8x32xf32>
    %256 = arith.mulf %254, %255 : vector<2x8x32xf32>
    %cst_94 = arith.constant dense<0.000000e+00> : vector<2x8xf32>
    %257 = vector.multi_reduction <add>, %256, %cst_94 [2] : vector<2x8x32xf32> to vector<2x8xf32>
    %258 = vector.shape_cast %257 : vector<2x8xf32> to vector<2x8x1xf32>
    %259 = arith.addf %258, %2 : vector<2x8x1xf32>
    %cst_95 = arith.constant dense<0xFF800000> : vector<2x1xf32>
    %260 = vector.multi_reduction <maximumf>, %259, %cst_95 [1] : vector<2x8x1xf32> to vector<2x1xf32>
    %261 = vector.shape_cast %260 : vector<2x1xf32> to vector<2x1x1xf32>
    %262 = vector.broadcast %261 : vector<2x1x1xf32> to vector<2x8x1xf32>
    %263 = arith.subf %259, %262 : vector<2x8x1xf32>
    %264 = math.exp %263 : vector<2x8x1xf32>
    %cst_96 = arith.constant dense<0.000000e+00> : vector<2x1xf32>
    %265 = vector.multi_reduction <add>, %264, %cst_96 [1] : vector<2x8x1xf32> to vector<2x1xf32>
    %266 = vector.shape_cast %265 : vector<2x1xf32> to vector<2x1x1xf32>
    %267 = vector.broadcast %266 : vector<2x1x1xf32> to vector<2x8x1xf32>
    %268 = arith.divf %264, %267 : vector<2x8x1xf32>
    %269 = vector.broadcast %268 : vector<2x8x1xf32> to vector<2x8x32xf32>
    %270 = arith.mulf %269, %0 : vector<2x8x32xf32>
    %cst_97 = arith.constant dense<0.000000e+00> : vector<2x32xf32>
    %271 = vector.multi_reduction <add>, %270, %cst_97 [1] : vector<2x8x32xf32> to vector<2x32xf32>
    %c2 = arith.constant 2 : index
    %c0_98 = arith.constant 0 : index
    %c0_99 = arith.constant 0 : index
    %272 = vector.load %arg1[%c2, %c0_98, %c0_99] : memref<4x2x96xf32, #tpu.memory_space<vmem>>, vector<1x2x96xf32>
    %273 = vector.shape_cast %272 : vector<1x2x96xf32> to vector<2x96xf32>
    %274 = arith.truncf %271 : vector<2x32xf32> to vector<2x32xbf16>
    %c0_100 = arith.constant 0 : index
    %c0_101 = arith.constant 0 : index
    %275 = vector.load %arg8[%c0_100, %c0_101] : memref<32x96xbf16, #tpu.memory_space<vmem>>, vector<32x96xbf16>
    %cst_102 = arith.constant dense<0.000000e+00> : vector<2x96xf32>
    %276 = tpu.matmul %274, %275, %cst_102 {dimension_numbers = #tpu.dot_dimension_numbers<[1], [0], [0], [1], [0, 0, 1, 1], [], []>} : vector<2x32xbf16>, vector<32x96xbf16>, vector<2x96xf32> -> vector<2x96xf32>
    %277 = arith.addf %273, %276 : vector<2x96xf32>
    %278 = vector.extract_strided_slice %277 {offsets = [0, 0], sizes = [2, 32], strides = [1, 1]} : vector<2x96xf32> to vector<2x32xf32>
    %279 = vector.extract_strided_slice %242 {offsets = [0, 0], sizes = [2, 32], strides = [1, 1]} : vector<2x96xf32> to vector<2x32xf32>
    %280 = arith.addf %278, %279 : vector<2x32xf32>
    %281 = arith.negf %280 : vector<2x32xf32>
    %282 = math.exp %281 : vector<2x32xf32>
    %cst_103 = arith.constant 1.000000e+00 : f32
    %283 = vector.broadcast %cst_103 : f32 to vector<2x32xf32>
    %284 = arith.addf %283, %282 : vector<2x32xf32>
    %285 = arith.divf %283, %284 : vector<2x32xf32>
    %286 = vector.extract_strided_slice %277 {offsets = [0, 32], sizes = [2, 32], strides = [1, 1]} : vector<2x96xf32> to vector<2x32xf32>
    %287 = vector.extract_strided_slice %242 {offsets = [0, 32], sizes = [2, 32], strides = [1, 1]} : vector<2x96xf32> to vector<2x32xf32>
    %288 = arith.addf %286, %287 : vector<2x32xf32>
    %289 = arith.negf %288 : vector<2x32xf32>
    %290 = math.exp %289 : vector<2x32xf32>
    %cst_104 = arith.constant 1.000000e+00 : f32
    %291 = vector.broadcast %cst_104 : f32 to vector<2x32xf32>
    %292 = arith.addf %291, %290 : vector<2x32xf32>
    %293 = arith.divf %291, %292 : vector<2x32xf32>
    %294 = vector.extract_strided_slice %277 {offsets = [0, 64], sizes = [2, 32], strides = [1, 1]} : vector<2x96xf32> to vector<2x32xf32>
    %295 = vector.extract_strided_slice %242 {offsets = [0, 64], sizes = [2, 32], strides = [1, 1]} : vector<2x96xf32> to vector<2x32xf32>
    %296 = arith.mulf %285, %295 : vector<2x32xf32>
    %297 = arith.addf %294, %296 : vector<2x32xf32>
    %298 = math.tanh %297 : vector<2x32xf32>
    %cst_105 = arith.constant 1.000000e+00 : f32
    %299 = vector.broadcast %cst_105 : f32 to vector<2x32xf32>
    %300 = arith.subf %299, %293 : vector<2x32xf32>
    %301 = arith.mulf %300, %298 : vector<2x32xf32>
    %302 = arith.mulf %293, %193 : vector<2x32xf32>
    %303 = arith.addf %301, %302 : vector<2x32xf32>
    %304 = arith.truncf %303 : vector<2x32xf32> to vector<2x32xbf16>
    %c0_106 = arith.constant 0 : index
    %c0_107 = arith.constant 0 : index
    %305 = vector.load %arg9[%c0_106, %c0_107] : memref<32x96xbf16, #tpu.memory_space<vmem>>, vector<32x96xbf16>
    %cst_108 = arith.constant dense<0.000000e+00> : vector<2x96xf32>
    %306 = tpu.matmul %304, %305, %cst_108 {dimension_numbers = #tpu.dot_dimension_numbers<[1], [0], [0], [1], [0, 0, 1, 1], [], []>} : vector<2x32xbf16>, vector<32x96xbf16>, vector<2x96xf32> -> vector<2x96xf32>
    %307 = vector.broadcast %8 : vector<1x96xf32> to vector<2x96xf32>
    %308 = arith.addf %306, %307 : vector<2x96xf32>
    %309 = vector.extract_strided_slice %308 {offsets = [0, 0], sizes = [2, 32], strides = [1, 1]} : vector<2x96xf32> to vector<2x32xf32>
    %310 = vector.extract_strided_slice %246 {offsets = [0, 0], sizes = [2, 32], strides = [1, 1]} : vector<2x96xf32> to vector<2x32xf32>
    %311 = arith.addf %309, %310 : vector<2x32xf32>
    %312 = arith.negf %311 : vector<2x32xf32>
    %313 = math.exp %312 : vector<2x32xf32>
    %cst_109 = arith.constant 1.000000e+00 : f32
    %314 = vector.broadcast %cst_109 : f32 to vector<2x32xf32>
    %315 = arith.addf %314, %313 : vector<2x32xf32>
    %316 = arith.divf %314, %315 : vector<2x32xf32>
    %317 = vector.extract_strided_slice %308 {offsets = [0, 32], sizes = [2, 32], strides = [1, 1]} : vector<2x96xf32> to vector<2x32xf32>
    %318 = vector.extract_strided_slice %246 {offsets = [0, 32], sizes = [2, 32], strides = [1, 1]} : vector<2x96xf32> to vector<2x32xf32>
    %319 = arith.addf %317, %318 : vector<2x32xf32>
    %320 = arith.negf %319 : vector<2x32xf32>
    %321 = math.exp %320 : vector<2x32xf32>
    %cst_110 = arith.constant 1.000000e+00 : f32
    %322 = vector.broadcast %cst_110 : f32 to vector<2x32xf32>
    %323 = arith.addf %322, %321 : vector<2x32xf32>
    %324 = arith.divf %322, %323 : vector<2x32xf32>
    %325 = vector.extract_strided_slice %308 {offsets = [0, 64], sizes = [2, 32], strides = [1, 1]} : vector<2x96xf32> to vector<2x32xf32>
    %326 = vector.extract_strided_slice %246 {offsets = [0, 64], sizes = [2, 32], strides = [1, 1]} : vector<2x96xf32> to vector<2x32xf32>
    %327 = arith.mulf %316, %326 : vector<2x32xf32>
    %328 = arith.addf %325, %327 : vector<2x32xf32>
    %329 = math.tanh %328 : vector<2x32xf32>
    %cst_111 = arith.constant 1.000000e+00 : f32
    %330 = vector.broadcast %cst_111 : f32 to vector<2x32xf32>
    %331 = arith.subf %330, %324 : vector<2x32xf32>
    %332 = arith.mulf %331, %329 : vector<2x32xf32>
    %333 = arith.mulf %324, %224 : vector<2x32xf32>
    %334 = arith.addf %332, %333 : vector<2x32xf32>
    %335 = arith.truncf %334 : vector<2x32xf32> to vector<2x32xbf16>
    %c0_112 = arith.constant 0 : index
    %c0_113 = arith.constant 0 : index
    %336 = vector.load %arg10[%c0_112, %c0_113] : memref<32x16xbf16, #tpu.memory_space<vmem>>, vector<32x16xbf16>
    %cst_114 = arith.constant dense<0.000000e+00> : vector<2x16xf32>
    %337 = tpu.matmul %335, %336, %cst_114 {dimension_numbers = #tpu.dot_dimension_numbers<[1], [0], [0], [1], [0, 0, 1, 1], [], []>} : vector<2x32xbf16>, vector<32x16xbf16>, vector<2x16xf32> -> vector<2x16xf32>
    %338 = vector.broadcast %10 : vector<1x16xf32> to vector<2x16xf32>
    %339 = arith.addf %337, %338 : vector<2x16xf32>
    %c2_115 = arith.constant 2 : index
    %c0_116 = arith.constant 0 : index
    %c0_117 = arith.constant 0 : index
    %340 = vector.load %arg17[%c2_115, %c0_116, %c0_117] : memref<4x2x16xf32, #tpu.memory_space<vmem>>, vector<1x2x16xf32>
    %341 = vector.shape_cast %340 : vector<1x2x16xf32> to vector<2x16xf32>
    %342 = vector.shape_cast %339 : vector<2x16xf32> to vector<1x2x16xf32>
    tpu.vector_store %arg17[%c2_115, %c0_116, %c0_117], %342 {strides = array<i32>} : memref<4x2x16xf32, #tpu.memory_space<vmem>>, vector<1x2x16xf32>,
    %c2_118 = arith.constant 2 : index
    %c0_119 = arith.constant 0 : index
    %c0_120 = arith.constant 0 : index
    %c0_121 = arith.constant 0 : index
    %343 = vector.load %arg19[%c2_118, %c0_119, %c0_120, %c0_121] : memref<4x2x8x1xf32, #tpu.memory_space<vmem>>, vector<1x2x8x1xf32>
    %344 = vector.shape_cast %343 : vector<1x2x8x1xf32> to vector<2x8x1xf32>
    %345 = vector.shape_cast %268 : vector<2x8x1xf32> to vector<1x2x8x1xf32>
    tpu.vector_store %arg19[%c2_118, %c0_119, %c0_120, %c0_121], %345 {strides = array<i32>} : memref<4x2x8x1xf32, #tpu.memory_space<vmem>>, vector<1x2x8x1xf32>,
    %346 = tpu.concatenate %303, %334 in 1 : vector<2x32xf32>, vector<2x32xf32> -> vector<2x64xf32>
    %347 = arith.truncf %346 : vector<2x64xf32> to vector<2x64xbf16>
    %c0_122 = arith.constant 0 : index
    %c0_123 = arith.constant 0 : index
    %348 = vector.load %arg7[%c0_122, %c0_123] : memref<64x224xbf16, #tpu.memory_space<vmem>>, vector<64x224xbf16>
    %cst_124 = arith.constant dense<0.000000e+00> : vector<2x224xf32>
    %349 = tpu.matmul %347, %348, %cst_124 {dimension_numbers = #tpu.dot_dimension_numbers<[1], [0], [0], [1], [0, 0, 1, 1], [], []>} : vector<2x64xbf16>, vector<64x224xbf16>, vector<2x224xf32> -> vector<2x224xf32>
    %350 = vector.extract_strided_slice %349 {offsets = [0, 0], sizes = [2, 96], strides = [1, 1]} : vector<2x224xf32> to vector<2x96xf32>
    %351 = vector.broadcast %7 : vector<1x96xf32> to vector<2x96xf32>
    %352 = arith.addf %350, %351 : vector<2x96xf32>
    %353 = vector.extract_strided_slice %349 {offsets = [0, 96], sizes = [2, 32], strides = [1, 1]} : vector<2x224xf32> to vector<2x32xf32>
    %354 = vector.extract_strided_slice %349 {offsets = [0, 128], sizes = [2, 96], strides = [1, 1]} : vector<2x224xf32> to vector<2x96xf32>
    %355 = vector.broadcast %9 : vector<1x96xf32> to vector<2x96xf32>
    %356 = arith.addf %354, %355 : vector<2x96xf32>
    %357 = vector.shape_cast %353 : vector<2x32xf32> to vector<2x1x32xf32>
    %358 = vector.broadcast %357 : vector<2x1x32xf32> to vector<2x8x32xf32>
    %359 = arith.addf %1, %358 : vector<2x8x32xf32>
    %360 = vector.broadcast %268 : vector<2x8x1xf32> to vector<2x8x32xf32>
    %361 = vector.broadcast %4 : vector<1x1x32xf32> to vector<2x8x32xf32>
    %362 = arith.mulf %360, %361 : vector<2x8x32xf32>
    %363 = arith.addf %359, %362 : vector<2x8x32xf32>
    %364 = math.tanh %363 : vector<2x8x32xf32>
    %365 = vector.broadcast %6 : vector<1x1x32xf32> to vector<2x8x32xf32>
    %366 = arith.mulf %364, %365 : vector<2x8x32xf32>
    %cst_125 = arith.constant dense<0.000000e+00> : vector<2x8xf32>
    %367 = vector.multi_reduction <add>, %366, %cst_125 [2] : vector<2x8x32xf32> to vector<2x8xf32>
    %368 = vector.shape_cast %367 : vector<2x8xf32> to vector<2x8x1xf32>
    %369 = arith.addf %368, %2 : vector<2x8x1xf32>
    %cst_126 = arith.constant dense<0xFF800000> : vector<2x1xf32>
    %370 = vector.multi_reduction <maximumf>, %369, %cst_126 [1] : vector<2x8x1xf32> to vector<2x1xf32>
    %371 = vector.shape_cast %370 : vector<2x1xf32> to vector<2x1x1xf32>
    %372 = vector.broadcast %371 : vector<2x1x1xf32> to vector<2x8x1xf32>
    %373 = arith.subf %369, %372 : vector<2x8x1xf32>
    %374 = math.exp %373 : vector<2x8x1xf32>
    %cst_127 = arith.constant dense<0.000000e+00> : vector<2x1xf32>
    %375 = vector.multi_reduction <add>, %374, %cst_127 [1] : vector<2x8x1xf32> to vector<2x1xf32>
    %376 = vector.shape_cast %375 : vector<2x1xf32> to vector<2x1x1xf32>
    %377 = vector.broadcast %376 : vector<2x1x1xf32> to vector<2x8x1xf32>
    %378 = arith.divf %374, %377 : vector<2x8x1xf32>
    %379 = vector.broadcast %378 : vector<2x8x1xf32> to vector<2x8x32xf32>
    %380 = arith.mulf %379, %0 : vector<2x8x32xf32>
    %cst_128 = arith.constant dense<0.000000e+00> : vector<2x32xf32>
    %381 = vector.multi_reduction <add>, %380, %cst_128 [1] : vector<2x8x32xf32> to vector<2x32xf32>
    %c3 = arith.constant 3 : index
    %c0_129 = arith.constant 0 : index
    %c0_130 = arith.constant 0 : index
    %382 = vector.load %arg1[%c3, %c0_129, %c0_130] : memref<4x2x96xf32, #tpu.memory_space<vmem>>, vector<1x2x96xf32>
    %383 = vector.shape_cast %382 : vector<1x2x96xf32> to vector<2x96xf32>
    %384 = arith.truncf %381 : vector<2x32xf32> to vector<2x32xbf16>
    %c0_131 = arith.constant 0 : index
    %c0_132 = arith.constant 0 : index
    %385 = vector.load %arg8[%c0_131, %c0_132] : memref<32x96xbf16, #tpu.memory_space<vmem>>, vector<32x96xbf16>
    %cst_133 = arith.constant dense<0.000000e+00> : vector<2x96xf32>
    %386 = tpu.matmul %384, %385, %cst_133 {dimension_numbers = #tpu.dot_dimension_numbers<[1], [0], [0], [1], [0, 0, 1, 1], [], []>} : vector<2x32xbf16>, vector<32x96xbf16>, vector<2x96xf32> -> vector<2x96xf32>
    %387 = arith.addf %383, %386 : vector<2x96xf32>
    %388 = vector.extract_strided_slice %387 {offsets = [0, 0], sizes = [2, 32], strides = [1, 1]} : vector<2x96xf32> to vector<2x32xf32>
    %389 = vector.extract_strided_slice %352 {offsets = [0, 0], sizes = [2, 32], strides = [1, 1]} : vector<2x96xf32> to vector<2x32xf32>
    %390 = arith.addf %388, %389 : vector<2x32xf32>
    %391 = arith.negf %390 : vector<2x32xf32>
    %392 = math.exp %391 : vector<2x32xf32>
    %cst_134 = arith.constant 1.000000e+00 : f32
    %393 = vector.broadcast %cst_134 : f32 to vector<2x32xf32>
    %394 = arith.addf %393, %392 : vector<2x32xf32>
    %395 = arith.divf %393, %394 : vector<2x32xf32>
    %396 = vector.extract_strided_slice %387 {offsets = [0, 32], sizes = [2, 32], strides = [1, 1]} : vector<2x96xf32> to vector<2x32xf32>
    %397 = vector.extract_strided_slice %352 {offsets = [0, 32], sizes = [2, 32], strides = [1, 1]} : vector<2x96xf32> to vector<2x32xf32>
    %398 = arith.addf %396, %397 : vector<2x32xf32>
    %399 = arith.negf %398 : vector<2x32xf32>
    %400 = math.exp %399 : vector<2x32xf32>
    %cst_135 = arith.constant 1.000000e+00 : f32
    %401 = vector.broadcast %cst_135 : f32 to vector<2x32xf32>
    %402 = arith.addf %401, %400 : vector<2x32xf32>
    %403 = arith.divf %401, %402 : vector<2x32xf32>
    %404 = vector.extract_strided_slice %387 {offsets = [0, 64], sizes = [2, 32], strides = [1, 1]} : vector<2x96xf32> to vector<2x32xf32>
    %405 = vector.extract_strided_slice %352 {offsets = [0, 64], sizes = [2, 32], strides = [1, 1]} : vector<2x96xf32> to vector<2x32xf32>
    %406 = arith.mulf %395, %405 : vector<2x32xf32>
    %407 = arith.addf %404, %406 : vector<2x32xf32>
    %408 = math.tanh %407 : vector<2x32xf32>
    %cst_136 = arith.constant 1.000000e+00 : f32
    %409 = vector.broadcast %cst_136 : f32 to vector<2x32xf32>
    %410 = arith.subf %409, %403 : vector<2x32xf32>
    %411 = arith.mulf %410, %408 : vector<2x32xf32>
    %412 = arith.mulf %403, %303 : vector<2x32xf32>
    %413 = arith.addf %411, %412 : vector<2x32xf32>
    %414 = arith.truncf %413 : vector<2x32xf32> to vector<2x32xbf16>
    %c0_137 = arith.constant 0 : index
    %c0_138 = arith.constant 0 : index
    %415 = vector.load %arg9[%c0_137, %c0_138] : memref<32x96xbf16, #tpu.memory_space<vmem>>, vector<32x96xbf16>
    %cst_139 = arith.constant dense<0.000000e+00> : vector<2x96xf32>
    %416 = tpu.matmul %414, %415, %cst_139 {dimension_numbers = #tpu.dot_dimension_numbers<[1], [0], [0], [1], [0, 0, 1, 1], [], []>} : vector<2x32xbf16>, vector<32x96xbf16>, vector<2x96xf32> -> vector<2x96xf32>
    %417 = vector.broadcast %8 : vector<1x96xf32> to vector<2x96xf32>
    %418 = arith.addf %416, %417 : vector<2x96xf32>
    %419 = vector.extract_strided_slice %418 {offsets = [0, 0], sizes = [2, 32], strides = [1, 1]} : vector<2x96xf32> to vector<2x32xf32>
    %420 = vector.extract_strided_slice %356 {offsets = [0, 0], sizes = [2, 32], strides = [1, 1]} : vector<2x96xf32> to vector<2x32xf32>
    %421 = arith.addf %419, %420 : vector<2x32xf32>
    %422 = arith.negf %421 : vector<2x32xf32>
    %423 = math.exp %422 : vector<2x32xf32>
    %cst_140 = arith.constant 1.000000e+00 : f32
    %424 = vector.broadcast %cst_140 : f32 to vector<2x32xf32>
    %425 = arith.addf %424, %423 : vector<2x32xf32>
    %426 = arith.divf %424, %425 : vector<2x32xf32>
    %427 = vector.extract_strided_slice %418 {offsets = [0, 32], sizes = [2, 32], strides = [1, 1]} : vector<2x96xf32> to vector<2x32xf32>
    %428 = vector.extract_strided_slice %356 {offsets = [0, 32], sizes = [2, 32], strides = [1, 1]} : vector<2x96xf32> to vector<2x32xf32>
    %429 = arith.addf %427, %428 : vector<2x32xf32>
    %430 = arith.negf %429 : vector<2x32xf32>
    %431 = math.exp %430 : vector<2x32xf32>
    %cst_141 = arith.constant 1.000000e+00 : f32
    %432 = vector.broadcast %cst_141 : f32 to vector<2x32xf32>
    %433 = arith.addf %432, %431 : vector<2x32xf32>
    %434 = arith.divf %432, %433 : vector<2x32xf32>
    %435 = vector.extract_strided_slice %418 {offsets = [0, 64], sizes = [2, 32], strides = [1, 1]} : vector<2x96xf32> to vector<2x32xf32>
    %436 = vector.extract_strided_slice %356 {offsets = [0, 64], sizes = [2, 32], strides = [1, 1]} : vector<2x96xf32> to vector<2x32xf32>
    %437 = arith.mulf %426, %436 : vector<2x32xf32>
    %438 = arith.addf %435, %437 : vector<2x32xf32>
    %439 = math.tanh %438 : vector<2x32xf32>
    %cst_142 = arith.constant 1.000000e+00 : f32
    %440 = vector.broadcast %cst_142 : f32 to vector<2x32xf32>
    %441 = arith.subf %440, %434 : vector<2x32xf32>
    %442 = arith.mulf %441, %439 : vector<2x32xf32>
    %443 = arith.mulf %434, %334 : vector<2x32xf32>
    %444 = arith.addf %442, %443 : vector<2x32xf32>
    %445 = arith.truncf %444 : vector<2x32xf32> to vector<2x32xbf16>
    %c0_143 = arith.constant 0 : index
    %c0_144 = arith.constant 0 : index
    %446 = vector.load %arg10[%c0_143, %c0_144] : memref<32x16xbf16, #tpu.memory_space<vmem>>, vector<32x16xbf16>
    %cst_145 = arith.constant dense<0.000000e+00> : vector<2x16xf32>
    %447 = tpu.matmul %445, %446, %cst_145 {dimension_numbers = #tpu.dot_dimension_numbers<[1], [0], [0], [1], [0, 0, 1, 1], [], []>} : vector<2x32xbf16>, vector<32x16xbf16>, vector<2x16xf32> -> vector<2x16xf32>
    %448 = vector.broadcast %10 : vector<1x16xf32> to vector<2x16xf32>
    %449 = arith.addf %447, %448 : vector<2x16xf32>
    %c3_146 = arith.constant 3 : index
    %c0_147 = arith.constant 0 : index
    %c0_148 = arith.constant 0 : index
    %450 = vector.load %arg17[%c3_146, %c0_147, %c0_148] : memref<4x2x16xf32, #tpu.memory_space<vmem>>, vector<1x2x16xf32>
    %451 = vector.shape_cast %450 : vector<1x2x16xf32> to vector<2x16xf32>
    %452 = vector.shape_cast %449 : vector<2x16xf32> to vector<1x2x16xf32>
    tpu.vector_store %arg17[%c3_146, %c0_147, %c0_148], %452 {strides = array<i32>} : memref<4x2x16xf32, #tpu.memory_space<vmem>>, vector<1x2x16xf32>,
    %c3_149 = arith.constant 3 : index
    %c0_150 = arith.constant 0 : index
    %c0_151 = arith.constant 0 : index
    %c0_152 = arith.constant 0 : index
    %453 = vector.load %arg19[%c3_149, %c0_150, %c0_151, %c0_152] : memref<4x2x8x1xf32, #tpu.memory_space<vmem>>, vector<1x2x8x1xf32>
    %454 = vector.shape_cast %453 : vector<1x2x8x1xf32> to vector<2x8x1xf32>
    %455 = vector.shape_cast %378 : vector<2x8x1xf32> to vector<1x2x8x1xf32>
    tpu.vector_store %arg19[%c3_149, %c0_150, %c0_151, %c0_152], %455 {strides = array<i32>} : memref<4x2x8x1xf32, #tpu.memory_space<vmem>>, vector<1x2x8x1xf32>,
    %c0_153 = arith.constant 0 : index
    %c0_154 = arith.constant 0 : index
    %c0_155 = arith.constant 0 : index
    %456 = vector.load %arg18[%c0_153, %c0_154, %c0_155] : memref<2x2x32xf32, #tpu.memory_space<vmem>>, vector<1x2x32xf32>
    %457 = vector.shape_cast %456 : vector<1x2x32xf32> to vector<2x32xf32>
    %458 = vector.shape_cast %413 : vector<2x32xf32> to vector<1x2x32xf32>
    tpu.vector_store %arg18[%c0_153, %c0_154, %c0_155], %458 {strides = array<i32>} : memref<2x2x32xf32, #tpu.memory_space<vmem>>, vector<1x2x32xf32>,
    %c1_156 = arith.constant 1 : index
    %c0_157 = arith.constant 0 : index
    %c0_158 = arith.constant 0 : index
    %459 = vector.load %arg18[%c1_156, %c0_157, %c0_158] : memref<2x2x32xf32, #tpu.memory_space<vmem>>, vector<1x2x32xf32>
    %460 = vector.shape_cast %459 : vector<1x2x32xf32> to vector<2x32xf32>
    %461 = vector.shape_cast %444 : vector<2x32xf32> to vector<1x2x32xf32>
    tpu.vector_store %arg18[%c1_156, %c0_157, %c0_158], %461 {strides = array<i32>} : memref<2x2x32xf32, #tpu.memory_space<vmem>>, vector<1x2x32xf32>,
    return
  }
  func.func @transform_0(%arg0: i32) -> (i32, i32, i32) {
    %c0_i32 = arith.constant 0 : i32
    %c0_i32_0 = arith.constant 0 : i32
    %c0_i32_1 = arith.constant 0 : i32
    %c0_i32_2 = arith.constant 0 : i32
    return %c0_i32, %c0_i32_0, %c0_i32_1 : i32, i32, i32
  }
  func.func @transform_1(%arg0: i32) -> (i32, i32, i32) {
    %c0_i32 = arith.constant 0 : i32
    %c0_i32_0 = arith.constant 0 : i32
    %c0_i32_1 = arith.constant 0 : i32
    %c0_i32_2 = arith.constant 0 : i32
    return %c0_i32, %c0_i32_0, %c0_i32_1 : i32, i32, i32
  }
  func.func @transform_2(%arg0: i32) -> (i32, i32, i32) {
    %c0_i32 = arith.constant 0 : i32
    %c0_i32_0 = arith.constant 0 : i32
    %c0_i32_1 = arith.constant 0 : i32
    %c0_i32_2 = arith.constant 0 : i32
    return %c0_i32, %c0_i32_0, %c0_i32_1 : i32, i32, i32
  }
  func.func @transform_3(%arg0: i32) -> (i32, i32, i32) {
    %c0_i32 = arith.constant 0 : i32
    %c0_i32_0 = arith.constant 0 : i32
    %c0_i32_1 = arith.constant 0 : i32
    %c0_i32_2 = arith.constant 0 : i32
    return %c0_i32, %c0_i32_0, %c0_i32_1 : i32, i32, i32
  }
  func.func @transform_4(%arg0: i32) -> (i32, i32, i32) {
    %c0_i32 = arith.constant 0 : i32
    %c0_i32_0 = arith.constant 0 : i32
    %c0_i32_1 = arith.constant 0 : i32
    %c0_i32_2 = arith.constant 0 : i32
    return %c0_i32, %c0_i32_0, %c0_i32_1 : i32, i32, i32
  }
  func.func @transform_5(%arg0: i32) -> (i32, i32, i32) {
    %c0_i32 = arith.constant 0 : i32
    %c0_i32_0 = arith.constant 0 : i32
    %c0_i32_1 = arith.constant 0 : i32
    %c0_i32_2 = arith.constant 0 : i32
    return %c0_i32, %c0_i32_0, %c0_i32_1 : i32, i32, i32
  }
  func.func @transform_6(%arg0: i32) -> (i32, i32) {
    %c0_i32 = arith.constant 0 : i32
    %c0_i32_0 = arith.constant 0 : i32
    %c0_i32_1 = arith.constant 0 : i32
    return %c0_i32, %c0_i32_0 : i32, i32
  }
  func.func @transform_7(%arg0: i32) -> (i32, i32) {
    %c0_i32 = arith.constant 0 : i32
    %c0_i32_0 = arith.constant 0 : i32
    %c0_i32_1 = arith.constant 0 : i32
    return %c0_i32, %c0_i32_0 : i32, i32
  }
  func.func @transform_8(%arg0: i32) -> (i32, i32) {
    %c0_i32 = arith.constant 0 : i32
    %c0_i32_0 = arith.constant 0 : i32
    %c0_i32_1 = arith.constant 0 : i32
    return %c0_i32, %c0_i32_0 : i32, i32
  }
  func.func @transform_9(%arg0: i32) -> (i32, i32) {
    %c0_i32 = arith.constant 0 : i32
    %c0_i32_0 = arith.constant 0 : i32
    %c0_i32_1 = arith.constant 0 : i32
    return %c0_i32, %c0_i32_0 : i32, i32
  }
  func.func @transform_10(%arg0: i32) -> (i32, i32) {
    %c0_i32 = arith.constant 0 : i32
    %c0_i32_0 = arith.constant 0 : i32
    %c0_i32_1 = arith.constant 0 : i32
    return %c0_i32, %c0_i32_0 : i32, i32
  }
  func.func @transform_11(%arg0: i32) -> (i32, i32) {
    %c0_i32 = arith.constant 0 : i32
    %c0_i32_0 = arith.constant 0 : i32
    %c0_i32_1 = arith.constant 0 : i32
    return %c0_i32, %c0_i32_0 : i32, i32
  }
  func.func @transform_12(%arg0: i32) -> (i32, i32) {
    %c0_i32 = arith.constant 0 : i32
    %c0_i32_0 = arith.constant 0 : i32
    %c0_i32_1 = arith.constant 0 : i32
    return %c0_i32, %c0_i32_0 : i32, i32
  }
  func.func @transform_13(%arg0: i32) -> (i32, i32) {
    %c0_i32 = arith.constant 0 : i32
    %c0_i32_0 = arith.constant 0 : i32
    %c0_i32_1 = arith.constant 0 : i32
    return %c0_i32, %c0_i32_0 : i32, i32
  }
  func.func @transform_14(%arg0: i32) -> (i32, i32) {
    %c0_i32 = arith.constant 0 : i32
    %c0_i32_0 = arith.constant 0 : i32
    %c0_i32_1 = arith.constant 0 : i32
    return %c0_i32, %c0_i32_0 : i32, i32
  }
  func.func @transform_15(%arg0: i32) -> (i32, i32) {
    %c0_i32 = arith.constant 0 : i32
    %c0_i32_0 = arith.constant 0 : i32
    %c0_i32_1 = arith.constant 0 : i32
    return %c0_i32, %c0_i32_0 : i32, i32
  }
  func.func @transform_16(%arg0: i32) -> (i32, i32, i32) {
    %c0_i32 = arith.constant 0 : i32
    %c0_i32_0 = arith.constant 0 : i32
    %c0_i32_1 = arith.constant 0 : i32
    %c0_i32_2 = arith.constant 0 : i32
    return %c0_i32, %c0_i32_0, %c0_i32_1 : i32, i32, i32
  }
  func.func @transform_17(%arg0: i32) -> (i32, i32, i32) {
    %c0_i32 = arith.constant 0 : i32
    %c0_i32_0 = arith.constant 0 : i32
    %c0_i32_1 = arith.constant 0 : i32
    %c0_i32_2 = arith.constant 0 : i32
    return %c0_i32, %c0_i32_0, %c0_i32_1 : i32, i32, i32
  }
  func.func @transform_18(%arg0: i32) -> (i32, i32, i32, i32) {
    %c0_i32 = arith.constant 0 : i32
    %c0_i32_0 = arith.constant 0 : i32
    %c0_i32_1 = arith.constant 0 : i32
    %c0_i32_2 = arith.constant 0 : i32
    %c0_i32_3 = arith.constant 0 : i32
    return %c0_i32, %c0_i32_0, %c0_i32_1, %c0_i32_2 : i32, i32, i32, i32
  }
}

</mosaic_0001>

<bundles_post_ra>
// kernel: tpu_custom_call.1
= control target key start
LH: loop header
LB: loop body
LE: loop exit
PB: predicated region body
PF: predicated region fallthrough
CT: control target
= control target key end

     0   :  { %s3485_s0 = inlined_call_operand.hbm [shape: f32[4,2,96], index: 0, kind: input, shape index: {}]   ;;  %s3486_s1 = inlined_call_operand.hbm [shape: f32[2,2,32], index: 1, kind: input, shape index: {}]   ;;  %s3487_s2 = inlined_call_operand.vmem [shape: f32[2,8,1], index: 2, kind: input, shape index: {}]   ;;  %s3488_s3 = inlined_call_operand.vmem [shape: f32[2,8,32], index: 3, kind: input, shape index: {}]   ;;  %s3489_s4 = inlined_call_operand.hbm [shape: f32[2,8,32], index: 4, kind: input, shape index: {}]   ;;  %s3490_s5 = inlined_call_operand.vmem [shape: f32[2,8,1], index: 5, kind: input, shape index: {}]   ;;  %s3491_s6 = inlined_call_operand.vmem [shape: bf16[64,224], index: 6, kind: input, shape index: {}]   ;;  %s3492_s7 = inlined_call_operand.hbm [shape: bf16[32,96], index: 7, kind: input, shape index: {}]   ;;  %s3493_s8 = inlined_call_operand.hbm [shape: bf16[32,96], index: 8, kind: input, shape index: {}]   ;;  %s3494_s9 = inlined_call_operand.vmem [shape: bf16[32,16], index: 9, kind: input, shape index: {}]   ;;  %s3495_s10 = inlined_call_operand.vmem [shape: f32[1,96], index: 10, kind: input, shape index: {}]   ;;  %s3496_s11 = inlined_call_operand.vmem [shape: f32[1,96], index: 11, kind: input, shape index: {}]   ;;  %s3497_s12 = inlined_call_operand.vmem [shape: f32[1,96], index: 12, kind: input, shape index: {}]   ;;  %s3498_s13 = inlined_call_operand.vmem [shape: f32[1,16], index: 13, kind: input, shape index: {}]   ;;  %s3499_s14 = inlined_call_operand.vmem [shape: f32[1,32], index: 14, kind: input, shape index: {}]   ;;  %s3500_s15 = inlined_call_operand.vmem [shape: f32[1,32], index: 15, kind: input, shape index: {}]   ;;  %s3501_s16 = inlined_call_operand.hbm [shape: f32[4,2,16], index: 16, kind: output, shape index: {0}]   ;;  %s3502_s17 = inlined_call_operand.hbm [shape: f32[2,2,32], index: 17, kind: output, shape index: {1}]   ;;  %s3503_s18 = inlined_call_operand.vmem [shape: f32[4,2,8,1], index: 18, kind: output, shape index: {2}]  }
   0x1   :  { %3515 = sst [smem:[#allocation19_spill]] %s3485_s0 }
   0x2   :  { %3516 = sst [smem:[#allocation20_spill]] %s3486_s1 }
   0x3   :  { %3517 = sst [smem:[#allocation21_spill]] %s3487_s2 }
   0x4   :  { %3518 = sst [smem:[#allocation22_spill]] %s3501_s16 }
   0x5   :  { %3519 = sst [smem:[#allocation23_spill]] %s3502_s17 }
   0x6   :  { %24 = vsyncpa [#allocation3], 0 }
   0x7   :  { %25 = vsyncpa [#allocation6], 0 }
   0x8   :  { %26 = vsyncpa [#allocation9], 0 }
   0x9   :  { %27 = vsyncpa [#allocation4], 0 }
   0xa   :  { %28 = vsyncpa [#allocation13], 0  ;;  %s2699_s27 = smov [#allocation5]   ;;  %s2700_s29 = smov [#allocation8]  }
   0xb   :  { %s46_s28 = sshll.u32 %s2699_s27, 4  ;;  %s78_s30 = sshll.u32 %s2700_s29, 4  ;;  %s47_s28 = int_to_ptr.vmem [resolvable:$true] %s46_s28  ;;  %s2812_s30 = int_to_ptr.vmem [resolvable:$true] %s78_s30 }
   0xc   :  { %s3520_s1 = sld [smem:[#allocation20_spill]] }
  0x12   :  { %s2535_s20 = scalar_lea.hbm %s3520_s1, 64 }
  0x13   :  { %p2536_p0 = scmp.ne.s32.totalorder %s3520_s1, %s2535_s20  ;;  %p2539_p1 = scmp.lt.u32.totalorder %s2535_s20, %s3520_s1 }
  0x15   :  { %p2541_p2 = pnand %p2539_p1, %p2536_p0 }
  0x17   :  { %2544 = shalt.err (!%p2541_p2)
}
  0x18   :  { %s2545_s24 = scalar_lea.vmem %s47_s28, 64  ;;  %p2550_p4 = scmp.lt.s32.totalorder %s47_s28, %s47_s28 }
  0x19   :  { %p2546_p3 = scmp.ne.s32.totalorder %s47_s28, %s2545_s24  ;;  %p2551_p5 = scmp.lt.s32.totalorder %s2545_s24, %s2545_s24 }
  0x1b   :  { %p2552_p6 = por %p2551_p5, %p2550_p4 }
  0x1d   :  { %p2553_p7 = pnand %p2552_p6, %p2546_p3 }
  0x1f   :  { %2556 = shalt.err (!%p2553_p7)
}
  0x20   :  { %s3507_s25 = smov 32   ;;  %s3509_s26 = smov 2  }
  0x21   :  { %52 = dma.hbm_to_vmem [thread:$0]  %s3520_s1, 64, %s47_s28, [#allocation6], %s3507_s25, %s3507_s25, %s3509_s26  }
  0x22   :  { %s2557_s20 = scalar_lea.hbm %s3492_s7, 256 }
  0x23   :  { %p2558_p8 = scmp.ne.s32.totalorder %s3492_s7, %s2557_s20  ;;  %p2561_p9 = scmp.lt.u32.totalorder %s2557_s20, %s3492_s7 }
  0x25   :  { %p2563_p10 = pnand %p2561_p9, %p2558_p8 }
  0x27   :  { %2566 = shalt.err (!%p2563_p10)
}
  0x28   :  { %s2567_s24 = scalar_lea.vmem %s2812_s30, 256  ;;  %p2572_p12 = scmp.lt.s32.totalorder %s2812_s30, %s2812_s30 }
  0x29   :  { %p2568_p11 = scmp.ne.s32.totalorder %s2812_s30, %s2567_s24  ;;  %p2573_p13 = scmp.lt.s32.totalorder %s2567_s24, %s2567_s24 }
  0x2b   :  { %p2574_p0 = por %p2573_p13, %p2572_p12 }
  0x2d   :  { %p2575_p1 = pnand %p2574_p0, %p2568_p11 }
  0x2f   :  { %2578 = shalt.err (!%p2575_p1)
}
  0x30   :  { %s3513_s28 = smov 64   ;;  %s2704_s1 = smov 4  }
  0x31   :  { %84 = dma.hbm_to_vmem [thread:$0]  %s3492_s7, 256, %s2812_s30, [#allocation9], %s3513_s28, %s3513_s28, %s2704_s1  }
  0x32   :  { %s2705_s0 = smov [#allocation2]   ;;  %s2706_s20 = smov [#allocation7]  }
  0x33   :  { %s34_s19 = sshll.u32 %s2705_s0, 4  ;;  %s62_s21 = sshll.u32 %s2706_s20, 4  ;;  %s35_s19 = int_to_ptr.vmem [resolvable:$true] %s34_s19  ;;  %s2849_s21 = int_to_ptr.vmem [resolvable:$true] %s62_s21 }
  0x34   :  { %s3521_s23 = sld [smem:[#allocation19_spill]] }
  0x3a   :  { %s2579_s24 = scalar_lea.hbm %s3521_s23, 128 }
  0x3b   :  { %p2580_p2 = scmp.ne.s32.totalorder %s3521_s23, %s2579_s24  ;;  %p2583_p3 = scmp.lt.u32.totalorder %s2579_s24, %s3521_s23 }
  0x3d   :  { %p2585_p4 = pnand %p2583_p3, %p2580_p2 }
  0x3f   :  { %2588 = shalt.err (!%p2585_p4)
}
  0x40   :  { %s2589_s7 = scalar_lea.vmem %s35_s19, 128  ;;  %p2594_p6 = scmp.lt.s32.totalorder %s35_s19, %s35_s19 }
  0x41   :  { %p2590_p5 = scmp.ne.s32.totalorder %s35_s19, %s2589_s7  ;;  %p2595_p7 = scmp.lt.s32.totalorder %s2589_s7, %s2589_s7 }
  0x43   :  { %p2596_p8 = por %p2595_p7, %p2594_p6 }
  0x45   :  { %p2597_p9 = pnand %p2596_p8, %p2590_p5 }
  0x47   :  { %2600 = shalt.err (!%p2597_p9)
}
  0x48   :  { %s3522_s30 = smov 2   ;;  %s3523_s27 = smov 32  }
  0x49   :  { %40 = dma.hbm_to_vmem [thread:$0]  %s3521_s23, 128, %s35_s19, [#allocation3], %s3523_s27, %s3523_s27, %s3522_s30  }
  0x4a   :  { %s2601_s16 = scalar_lea.hbm %s3489_s4, 256 }
  0x4b   :  { %p2602_p10 = scmp.ne.s32.totalorder %s3489_s4, %s2601_s16  ;;  %p2605_p11 = scmp.lt.u32.totalorder %s2601_s16, %s3489_s4 }
  0x4d   :  { %p2607_p12 = pnand %p2605_p11, %p2602_p10 }
  0x4f   :  { %2610 = shalt.err (!%p2607_p12)
}
  0x50   :  { %s2611_s24 = scalar_lea.vmem %s2849_s21, 256  ;;  %p2616_p0 = scmp.lt.s32.totalorder %s2849_s21, %s2849_s21 }
  0x51   :  { %p2612_p13 = scmp.ne.s32.totalorder %s2849_s21, %s2611_s24  ;;  %p2617_p1 = scmp.lt.s32.totalorder %s2611_s24, %s2611_s24 }
  0x53   :  { %p2618_p2 = por %p2617_p1, %p2616_p0 }
  0x55   :  { %p2619_p3 = pnand %p2618_p2, %p2612_p13 }
  0x57   :  { %2622 = shalt.err (!%p2619_p3)
}
  0x58   :  { %s2707_s19 = smov 128   ;;  %s2708_s23 = smov 8  }
  0x59   :  { %68 = dma.hbm_to_vmem [thread:$0]  %s3489_s4, 256, %s2849_s21, [#allocation6], %s2707_s19, %s2707_s19, %s2708_s23  }
  0x5a   :  { %s2709_s0 = smov [#allocation10]   ;;  %s2623_s17 = scalar_lea.hbm %s3493_s8, 256 }
  0x5b   :  { %s90_s25 = sshll.u32 %s2709_s0, 4  ;;  %p2624_p4 = scmp.ne.s32.totalorder %s3493_s8, %s2623_s17  ;;  %s91_s25 = int_to_ptr.vmem [resolvable:$true] %s90_s25 }
  0x5c   :  { %p2627_p5 = scmp.lt.u32.totalorder %s2623_s17, %s3493_s8 }
  0x5e   :  { %p2629_p6 = pnand %p2627_p5, %p2624_p4 }
  0x60   :  { %2632 = shalt.err (!%p2629_p6)
}
  0x61   :  { %s2633_s28 = scalar_lea.vmem %s91_s25, 256  ;;  %p2638_p8 = scmp.lt.s32.totalorder %s91_s25, %s91_s25 }
  0x62   :  { %p2634_p7 = scmp.ne.s32.totalorder %s91_s25, %s2633_s28  ;;  %p2639_p9 = scmp.lt.s32.totalorder %s2633_s28, %s2633_s28 }
  0x64   :  { %p2640_p10 = por %p2639_p9, %p2638_p8 }
  0x66   :  { %p2641_p11 = pnand %p2640_p10, %p2634_p7 }
  0x68   :  { %2644 = shalt.err (!%p2641_p11)
}
  0x69   :  { %s3524_s4 = smov 64  }
  0x6a   :  { %96 = dma.hbm_to_vmem [thread:$0]  %s3493_s8, 256, %s91_s25, [#allocation9], %s3524_s4, %s3524_s4, %s2704_s1  }
  0x6b   :  { %2689 = dma.done.wait [#allocation3], 128  }
  0x6c   :  { %2690 = vsyncadd [#allocation3], 4294967168 }
  0x6d   :  { %2691 = dma.done.wait [#allocation6], 320  }
  0x6e   :  { %2692 = vsyncadd [#allocation6], 4294966976 }
  0x6f   :  { %2693 = dma.done.wait [#allocation9], 512  }
  0x70   :  { %2694 = vsyncadd [#allocation9], 4294966784  ;;  %v2710_v0 = vmov 0   ;;  %v141_v1 = vld [vmem:[#allocation5 + $0x2] sm:$0x3]  ;;  %s3525_s24 = sld [smem:[#allocation21_spill]]  ;;  %v262_v18 = vlaneseq }
  0x71   :  { %235 = vmatprep.mubr.bf16.mxu0 %v2710_v0  ;;  %2378 = vset.pattern.permute.xlu1 %v2710_v0  ;;  %v2905_v2 = vld [vmem:[%s3491_s6 + $0x4] ss:$8 sps:$4 sm:$0xff]   ;;  %v2910_v3 = vld [vmem:[%s3491_s6] ss:$8 sps:$4 sm:$0xff]   ;;  %v2915_v4 = vld [vmem:[%s3491_s6 + $0x14] ss:$8 sps:$4 sm:$0xff]  }
  0x72   :  { %2377 = vset.pattern.permute.xlu0 %v2710_v0  ;;  %203 = vmatprep.subr.bf16.mxu0 %v2905_v2  ;;  %v2922_v5 = vld [vmem:[%s3491_s6 + $0x10] ss:$8 sps:$4 sm:$0xff]   ;;  %v2928_v6 = vld [vmem:[%s3491_s6 + $0x24] ss:$8 sps:$4 sm:$0xff]   ;;  %v2933_v7 = vld [vmem:[%s3491_s6 + $0x20] ss:$8 sps:$4 sm:$0xff]  }
  0x73   :  { %145 = vrot.lane.b32.xlu0 %v141_v1, %s3523_s27  ;;  %204 = vmatpush1.bf16.msra.mxu0 %v2910_v3  ;;  %v2944_v10 = vld [vmem:[%s3491_s6 + $0x34] ss:$8 sps:$4 sm:$0xff]   ;;  %v2951_v11 = vld [vmem:[%s3491_s6 + $0x30] ss:$8 sps:$4 sm:$0xff]   ;;  %vm148_vm0 = vcmask 261120   ;;  %vm199_vm1 = vcmask 523264  }
  0x74   :  { %205 = vmatprep.subr.bf16.mxu0 %v2915_v4  ;;  %v2956_v12 = vld [vmem:[#allocation5] sm:$0x3]  ;;  %v2711_v16 = vmov 1966171168   ;;  %v263_v20 = vshrl.u32 %v262_v18, 7  ;;  %v2985_v36 = vld [vmem:[#allocation7] sm:$0xff] }
  0x75   :  { %v260_v17 = vunpack.c.l.s4 %v2711_v16  ;;  %v2983_v35 = vld [vmem:[%s3499_s14] ss:$0 sm:$0xff]  ;;  %v2989_v40 = vld [vmem:[#allocation7 + $0x8] sm:$0xff]  ;;  %vm335_vm2 = vcmask 7168   ;;  %v3011_v56 = vld [vmem:[%s3490_s5 + $0x8] sm:$0xff]  ;;  %vm2713_vm3 = vmmov 0  }
  0x76   :  { %v143_v8 = vld [vmem:[%s3525_s24 + $0x8] sm:$0xff]  ;;  %v142_v9 = vld [vmem:[%s3525_s24] sm:$0xff]  ;;  %v2972_v25 = vsub.s32 0, %v263_v20  ;;  %vm411_vm4 = vcmask 1041409   ;;  %s2714_s25 = smov 96   ;;  %vm664_vm5 = vcmask 123904  }
  0x77   :  { %304 = vperm.xlu1 %2378, %v143_v8   ;;  %299 = vperm.xlu0 %2377, %v142_v9   ;;  %v261_v19 = vunpack.c.0.s8 %v260_v17  ;;  %v2996_v46 = vld [vmem:[%s3500_s15] ss:$0 sm:$0xff]  ;;  %vm2088_vm6 = vcmask 254976  }
  0x78   :  { %206 = vmatpush1.bf16.msra.mxu0 %v2922_v5  ;;  %v3005_v53 = vld [vmem:[%s3490_s5] sm:$0xff] }
  0x79   :  { %207 = vmatprep.subr.bf16.mxu0 %v2928_v6  ;;  %v2964_v21 = vsub.s32 %v261_v19, %v263_v20 }
  0x7c   :  { %208 = vmatpush1.bf16.msra.mxu0 %v2933_v7 }
  0x7d   :  { %209 = vmatprep.subr.bf16.mxu0 %v2944_v10 }
  0x80   :  { %210 = vmatpush1.bf16.msra.mxu0 %v2951_v11 }
  0xe5   :  { %v2958_v13 = vpop.permute.xlu0 %145 }
  0xe6   :  { %v149_v14 = vsel %vm148_vm0, %v2956_v12, %v2958_v13 }
  0xe7   :  { %v150_v15 = vpack.c.bf16 %v149_v14, %v149_v14 }
  0xe9   :  { %2143 = vmatmul.mubr.msk.bf16.vlgmr.msra.gmra.mrb[0].mxu0 %vm199_vm1, %v150_v15 }
  0xf6   :  { %v305_v33 = vpop.permute.xlu1 %304  ;;  %v300_v34 = vpop.permute.xlu0 %299 }
  0xf7   :  { %v313_v37 = vmul.f32 %v2983_v35, %v300_v34  ;;  %v314_v43 = vmul.f32 %v2983_v35, %v305_v33 }
 0x1bc   :  { %v2966_v22 = vpop.f32.mrb[0].mxu0 }
 0x1bd   :  { %v265_v23 = vrot.slane %v2966_v22, %v2964_v21  ;;  %v2970_v24 = vpop.f32.mrb[1].mxu0 }
 0x1be   :  { %v241_v26 = vpop.f32.mrb[2].mxu0 }
 0x1bf   :  { %v266_v27 = vcombine.high %v265_v23, %v265_v23  ;;  %v242_v28 = vpop.f32.mrb[3].mxu0  ;;  %v273_v29 = vrot.slane %v265_v23, %v2964_v21 }
 0x1c1   :  { %v284_v30 = vrot.slane %v273_v29, %v2972_v25  ;;  %v280_v31 = vrot.slane %v266_v27, %v2964_v21 }
 0x1c3   :  { %289 = vrot.lane.b32.xlu1 %v284_v30, %s3523_s27  ;;  %v288_v32 = vrot.slane %v280_v31, %v2972_v25 }
 0x1c7   :  { %291 = vrot.lane.b32.xlu1 %v288_v32, %s3523_s27 }
 0x235   :  { %v290_v38 = vpop.permute.xlu1 %289 }
 0x236   :  { %v295_v39 = vadd.f32 %v290_v38, %v2985_v36 }
 0x238   :  { %v315_v41 = vadd.f32 %v313_v37, %v295_v39 }
 0x239   :  { %v292_v42 = vpop.permute.xlu1 %291 }
 0x23a   :  { %2427 = vtanh.f32 %v315_v41  ;;  %v296_v44 = vadd.f32 %v292_v42, %v2989_v40 }
 0x23c   :  { %v316_v45 = vadd.f32 %v314_v43, %v296_v44 }
 0x23e   :  { %2429 = vtanh.f32 %v316_v45 }
 0x244   :  { %v2428_v47 = vpop.eup %2427 }
 0x245   :  { %v325_v48 = vmul.f32 %v2428_v47, %v2996_v46 }
 0x247   :  { %v327_v49 = vsel %vm148_vm0, %v325_v48, 0.0 }
 0x248   :  { %v2430_v50 = vpop.eup %2429  ;;  %328 = vadd.xlane.f32.xlu0 %v327_v49 }
 0x249   :  { %v326_v51 = vmul.f32 %v2430_v50, %v2996_v46  ;;  %v3021_v50 = vld [vmem:[%s3495_s10] ss:$0 sm:$0xff] }
 0x24b   :  { %v330_v52 = vsel %vm148_vm0, %v326_v51, 0.0 }
 0x24c   :  { %331 = vadd.xlane.f32.xlu1 %v330_v52 }
 0x2d5   :  { %v329_v54 = vpop.xlane.xlu0 %328 }
 0x2d6   :  { %v333_v55 = vadd.f32 %v329_v54, %v3005_v53  ;;  %v250_v54 = vadd.f32 %v3021_v50, %v2966_v22  ;;  %v3045_v22 = vld [vmem:[%s3488_s3] sm:$0xff] }
 0x2d8   :  { %v336_v57 = vsel %vm335_vm2, %v333_v55, -inf }
 0x2d9   :  { %v337_v58 = vrot.slane %v336_v57, 4  ;;  %v332_v59 = vpop.xlane.xlu1 %331 }
 0x2da   :  { %v334_v60 = vadd.f32 %v332_v59, %v3011_v56 }
 0x2db   :  { %v338_v61 = vmax.f32 %v336_v57, %v337_v58  ;;  %v2712_v57 = vmov 0.0   ;;  %v2392_v58 = vld [vmem:[#allocation8 + $0x8] sm:$0xff]  }
 0x2dc   :  { %v343_v62 = vsel %vm335_vm2, %v334_v60, -inf  ;;  %2263 = vmatprep.subr.bf16.mxu1 %v2712_v57  ;;  %2279 = vmatprep.subr.bf16.mxu0 %v2712_v57 }
 0x2dd   :  { %v339_v63 = vrot.slane %v338_v61, 2  ;;  %v344_v1 = vrot.slane %v343_v62, 4  ;;  %2267 = vmatprep.mubr.msk.bf16.mxu1 %vm2713_vm3, %v2712_v57  ;;  %2283 = vmatprep.mubr.msk.bf16.mxu0 %vm2713_vm3, %v2712_v57 }
 0x2df   :  { %v340_v8 = vmax.f32 %v338_v61, %v339_v63  ;;  %v345_v9 = vmax.f32 %v343_v62, %v344_v1  ;;  %v3054_v61 = vld [vmem:[%s3488_s3 + $0x8] sm:$0xff] }
 0x2e1   :  { %v341_v14 = vrot.slane %v340_v8, 1  ;;  %v346_v15 = vrot.slane %v345_v9, 2 }
 0x2e3   :  { %v342_v16 = vmax.f32 %v340_v8, %v341_v14  ;;  %v347_v17 = vmax.f32 %v345_v9, %v346_v15 }
 0x2e5   :  { %v350_v18 = vsub.f32 %v333_v55, %v342_v16  ;;  %v348_v19 = vrot.slane %v347_v17, 1  ;;  %v2391_v55 = vld [vmem:[#allocation8] sm:$0xff]  }
 0x2e6   :  { %2264 = vmatpush3.bf16.msra.mxu1 %v2391_v55  ;;  %v3070_v55 = vld [vmem:[%s3497_s12] ss:$0 sm:$0xff] }
 0x2e7   :  { %v352_v20 = vmul.f32 1.442695, %v350_v18  ;;  %v349_v23 = vmax.f32 %v347_v17, %v348_v19  ;;  %2265 = vmatprep.subr.bf16.mxu1 %v2712_v57 }
 0x2e9   :  { %2431 = vpow2.f32 %v352_v20  ;;  %v351_v26 = vsub.f32 %v334_v60, %v349_v23 }
 0x2ea   :  { %2266 = vmatpush3.bf16.msra.mxu1 %v2392_v58 }
 0x2eb   :  { %v354_v27 = vmul.f32 1.442695, %v351_v26  ;;  %2271 = vmatprep.subr.bf16.mxu1 %v2712_v57 }
 0x2ed   :  { %2433 = vpow2.f32 %v354_v27 }
 0x2f3   :  { %v2432_v28 = vpop.eup %2431 }
 0x2f4   :  { %v356_v29 = vsel %vm335_vm2, %v2432_v28, 0.0 }
 0x2f5   :  { %v357_v30 = vrot.slane %v356_v29, 4 }
 0x2f7   :  { %v2434_v31 = vpop.eup %2433  ;;  %v358_v32 = vadd.f32 %v357_v30, %v356_v29 }
 0x2f8   :  { %v363_v33 = vsel %vm335_vm2, %v2434_v31, 0.0 }
 0x2f9   :  { %v359_v34 = vrot.slane %v358_v32, 2  ;;  %v364_v37 = vrot.slane %v363_v33, 4 }
 0x2fb   :  { %v365_v38 = vadd.f32 %v364_v37, %v363_v33  ;;  %v360_v39 = vadd.f32 %v359_v34, %v358_v32  ;;  %v400_v37 = vld [vmem:[#allocation2] sm:$0x3] }
 0x2fd   :  { %v366_v41 = vrot.slane %v365_v38, 2  ;;  %v361_v42 = vrot.slane %v360_v39, 1 }
 0x2ff   :  { %v362_v43 = vadd.f32 %v361_v42, %v360_v39  ;;  %v367_v44 = vadd.f32 %v366_v41, %v365_v38 }
 0x301   :  { %2435 = vrcp.f32 %v362_v43  ;;  %v368_v45 = vrot.slane %v367_v44, 1 }
 0x303   :  { %v369_v47 = vadd.f32 %v368_v45, %v367_v44 }
 0x305   :  { %2437 = vrcp.f32 %v369_v47 }
 0x30b   :  { %v2436_v48 = vpop.eup %2435 }
 0x30c   :  { %v371_v49 = vmul.f32 %v2436_v48, %v2432_v28 }
 0x30e   :  { %376 = vperm.xlu0 %2377, %v371_v49   ;;  %666 = vst.msk [vmem:[%s3503_s18] sm:$0xff] %vm335_vm2, %v371_v49 }
 0x30f   :  { %v2438_v51 = vpop.eup %2437 }
 0x310   :  { %v373_v52 = vmul.f32 %v2438_v51, %v2434_v31 }
 0x312   :  { %381 = vperm.xlu1 %2378, %v373_v52   ;;  %667 = vst.msk [vmem:[%s3503_s18 + $0x8] sm:$0xff] %vm335_vm2, %v373_v52  ;;  %478 = vrot.lane.b32.xlu0 %v250_v54, %s3524_s4 }
 0x38d   :  { %v3047_v59 = vpop.permute.xlu0 %376 }
 0x38e   :  { %v384_v60 = vmul.f32 %v3047_v59, %v3045_v22 }
 0x390   :  { %v386_v62 = vsel %vm148_vm0, %v384_v60, 0.0 }
 0x391   :  { %v387_v63 = vrot.slane %v386_v62, 4  ;;  %v3057_v1 = vpop.permute.xlu1 %381  ;;  %v479_v51 = vpop.permute.xlu0 %478 }
 0x392   :  { %v385_v8 = vmul.f32 %v3057_v1, %v3054_v61 }
 0x393   :  { %v388_v9 = vadd.f32 %v387_v63, %v386_v62  ;;  %v2393_v62 = vld [vmem:[#allocation10] sm:$0xff]   ;;  %v2394_v63 = vld [vmem:[#allocation10 + $0x8] sm:$0xff]  }
 0x394   :  { %v393_v14 = vsel %vm148_vm0, %v385_v8, 0.0 }
 0x395   :  { %v389_v15 = vrot.slane %v388_v9, 2  ;;  %v394_v16 = vrot.slane %v393_v14, 4 }
 0x397   :  { %v390_v17 = vadd.f32 %v389_v15, %v388_v9  ;;  %v395_v18 = vadd.f32 %v394_v16, %v393_v14 }
 0x399   :  { %v391_v19 = vrot.slane %v390_v17, 1  ;;  %v396_v20 = vrot.slane %v395_v18, 2 }
 0x39b   :  { %v392_v23 = vadd.f32 %v391_v19, %v390_v17  ;;  %v397_v26 = vadd.f32 %v396_v20, %v395_v18  ;;  %v3098_v19 = vld [vmem:[%s3496_s11] ss:$0 sm:$0xff] }
 0x39d   :  { %v398_v27 = vrot.slane %v397_v26, 1  ;;  %v401_v28 = vpack.c.bf16 %v392_v23, %v392_v23 }
 0x39f   :  { %v399_v29 = vadd.f32 %v398_v27, %v397_v26  ;;  %v409_v31 = vunpack.c.l.b16 %v401_v28 }
 0x3a1   :  { %v402_v30 = vpack.c.bf16 %v399_v29, %v399_v29 }
 0x3a3   :  { %v410_v32 = vunpack.c.l.b16 %v402_v30 }
 0x3a5   :  { %v412_v33 = vsel %vm411_vm4, %v410_v32, %v409_v31 }
 0x3a6   :  { %v413_v34 = vpack.c.b16 %v412_v33, %v412_v33 }
 0x3a8   :  { %2268 = vmatmul.mubr.msk.bf16.vlgmr.msra.gmra.mrb[0].mxu1 %vm148_vm0, %v413_v34 }
 0x3a9   :  { %2275 = vmatprep.mubr.msk.bf16.mxu1 %vm2713_vm3, %v2712_v57  ;;  %2272 = vmatpush3.bf16.msra.mxu1 %v2393_v62 }
 0x3aa   :  { %2273 = vmatprep.subr.bf16.mxu1 %v2712_v57 }
 0x3ad   :  { %2274 = vmatpush3.bf16.msra.mxu1 %v2394_v63 }
 0x3ae   :  { %725 = vmatprep.subr.bf16.mxu1 %v2905_v2 }
 0x47b   :  { %v463_v38 = vpop.f32.mrb[0].mxu1 }
 0x47c   :  { %v469_v39 = vadd.f32 %v463_v38, %v400_v37  ;;  %v2269_v41 = vpop.f32.mrb[1].mxu1 }
 0x47d   :  { %v466_v42 = vpop.f32.mrb[2].mxu1 }
 0x47e   :  { %v470_v43 = vadd.f32 %v469_v39, %v250_v54  ;;  %v2270_v44 = vpop.f32.mrb[3].mxu1  ;;  %v257_v54 = vadd.f32 %v3070_v55, %v2970_v24 }
 0x480   :  { %v2151_v45 = vmul.f32 -1.442695, %v470_v43 }
 0x482   :  { %2439 = vpow2.f32 %v2151_v45 }
 0x48c   :  { %v2440_v47 = vpop.eup %2439 }
 0x48d   :  { %v474_v48 = vadd.f32 1.0, %v2440_v47 }
 0x48f   :  { %2441 = vrcp.f32 %v474_v48 }
 0x499   :  { %v2442_v49 = vpop.eup %2441 }
 0x49a   :  { %v481_v52 = vmul.f32 %v2442_v49, %v479_v51  ;;  %v488_v9 = vsub.f32 1.0, %v2442_v49 }
 0x49c   :  { %483 = vrot.lane.b32.xlu1 %v481_v52, %s3524_s4 }
 0x4a0   :  { %495 = vrot.lane.b32.xlu1 %v2956_v12, %s3523_s27 }
 0x4a4   :  { %577 = vrot.lane.b32.xlu1 %v257_v54, %s3524_s4 }
 0x50e   :  { %v484_v58 = vpop.permute.xlu1 %483 }
 0x50f   :  { %v486_v60 = vadd.f32 %v484_v58, %v469_v39 }
 0x511   :  { %2443 = vtanh.f32 %v486_v60 }
 0x512   :  { %v496_v12 = vpop.permute.xlu1 %495 }
 0x513   :  { %v498_v14 = vmul.f32 %v2442_v49, %v496_v12 }
 0x516   :  { %v578_v34 = vpop.permute.xlu1 %577 }
 0x51b   :  { %v2444_v8 = vpop.eup %2443 }
 0x51c   :  { %490 = vrot.lane.b32.xlu0 %v2444_v8, %s2714_s25 }
 0x58e   :  { %v491_v24 = vpop.permute.xlu0 %490 }
 0x58f   :  { %v493_v15 = vmul.f32 %v491_v24, %v488_v9 }
 0x591   :  { %v3080_v16 = vadd.f32 %v498_v14, %v493_v15  ;;  %v807_v14 = vmul.f32 %v2983_v35, %v3047_v59 }
 0x593   :  { %v500_v17 = vpack.c.bf16 %v3080_v16, %v3080_v16 }
 0x595   :  { %512 = vrot.lane.b32.xlu0 %v500_v17, %s2714_s25 }
 0x607   :  { %v513_v18 = vpop.permute.xlu0 %512 }
 0x608   :  { %2276 = vmatmul.mubr.msk.bf16.vlgmr.msra.gmra.mrb[4].mxu1 %vm148_vm0, %v513_v18  ;;  %v808_v18 = vmul.f32 %v2983_v35, %v3057_v1  ;;  %v2395_v1 = vld [vmem:[%s3494_s9] sm:$0xff]  }
 0x609   :  { %726 = vmatpush1.bf16.msra.mxu1 %v2910_v3  ;;  %757 = vmatprep.mubr.bf16.mxu1 %v2710_v0 }
 0x60a   :  { %727 = vmatprep.subr.bf16.mxu1 %v2915_v4  ;;  %2280 = vmatpush3.bf16.msra.mxu0 %v2395_v1 }
 0x60b   :  { %2281 = vmatprep.subr.bf16.mxu0 %v2712_v57 }
 0x60d   :  { %728 = vmatpush1.bf16.msra.mxu1 %v2922_v5 }
 0x60e   :  { %729 = vmatprep.subr.bf16.mxu1 %v2928_v6 }
 0x611   :  { %730 = vmatpush1.bf16.msra.mxu1 %v2933_v7 }
 0x612   :  { %731 = vmatprep.subr.bf16.mxu1 %v2944_v10 }
 0x615   :  { %732 = vmatpush1.bf16.msra.mxu1 %v2951_v11 }
 0x616   :  { %2303 = vmatprep.subr.bf16.mxu1 %v2712_v57 }
 0x6db   :  { %v563_v20 = vpop.f32.mrb[4].mxu1 }
 0x6dc   :  { %v564_v23 = vadd.f32 %v3098_v19, %v563_v20  ;;  %v2277_v26 = vpop.f32.mrb[5].mxu1 }
 0x6dd   :  { %v566_v27 = vpop.f32.mrb[6].mxu1 }
 0x6de   :  { %v569_v28 = vadd.f32 %v564_v23, %v257_v54  ;;  %v2278_v29 = vpop.f32.mrb[7].mxu1 }
 0x6e0   :  { %v2156_v30 = vmul.f32 -1.442695, %v569_v28 }
 0x6e2   :  { %2445 = vpow2.f32 %v2156_v30 }
 0x6ec   :  { %v2446_v31 = vpop.eup %2445 }
 0x6ed   :  { %v573_v32 = vadd.f32 1.0, %v2446_v31 }
 0x6ef   :  { %2447 = vrcp.f32 %v573_v32 }
 0x6f9   :  { %v2448_v33 = vpop.eup %2447 }
 0x6fa   :  { %v580_v37 = vmul.f32 %v2448_v33, %v578_v34  ;;  %v587_v42 = vsub.f32 1.0, %v2448_v33  ;;  %v593_v44 = vmul.f32 %v2448_v33, %v2958_v13 }
 0x6fc   :  { %582 = vrot.lane.b32.xlu0 %v580_v37, %s3524_s4 }
 0x700   :  { %669 = vrot.lane.b32.xlu0 %v3080_v16, %s2714_s25 }
 0x76e   :  { %v583_v38 = vpop.permute.xlu0 %582 }
 0x76f   :  { %v585_v39 = vadd.f32 %v583_v38, %v564_v23 }
 0x771   :  { %2449 = vtanh.f32 %v585_v39 }
 0x772   :  { %v670_v48 = vpop.permute.xlu0 %669 }
 0x77b   :  { %v2450_v41 = vpop.eup %2449 }
 0x77c   :  { %589 = vrot.lane.b32.xlu1 %v2450_v41, %s2714_s25 }
 0x7ee   :  { %v590_v43 = vpop.permute.xlu1 %589 }
 0x7ef   :  { %v592_v45 = vmul.f32 %v590_v43, %v587_v42 }
 0x7f1   :  { %v3106_v47 = vadd.f32 %v593_v44, %v592_v45 }
 0x7f3   :  { %v672_v49 = vsel %vm148_vm0, %v670_v48, %v3106_v47 }
 0x7f4   :  { %v673_v51 = vpack.c.bf16 %v672_v49, %v672_v49 }
 0x7f6   :  { %2169 = vmatmul.mubr.msk.bf16.vlgmr.msra.gmra.mrb[8].mxu1 %vm199_vm1, %v673_v51 }
 0x7f7   :  { %2307 = vmatprep.mubr.msk.bf16.mxu1 %vm2713_vm3, %v2712_v57 }
 0x8c9   :  { %v3113_v52 = vpop.f32.mrb[8].mxu1 }
 0x8ca   :  { %v775_v54 = vrot.slane %v3113_v52, %v2964_v21  ;;  %v3117_v58 = vpop.f32.mrb[9].mxu1 }
 0x8cb   :  { %v763_v13 = vpop.f32.mrb[10].mxu1 }
 0x8cc   :  { %v776_v60 = vcombine.high %v775_v54, %v775_v54  ;;  %v764_v62 = vpop.f32.mrb[11].mxu1  ;;  %v783_v63 = vrot.slane %v775_v54, %v2964_v21 }
 0x8ce   :  { %v794_v8 = vrot.slane %v783_v63, %v2972_v25  ;;  %v790_v12 = vrot.slane %v776_v60, %v2964_v21 }
 0x8d0   :  { %799 = vrot.lane.b32.xlu1 %v794_v8, %s3523_s27  ;;  %v798_v9 = vrot.slane %v790_v12, %v2972_v25 }
 0x8d2   :  { %801 = vrot.lane.b32.xlu0 %v798_v9, %s3523_s27 }
 0x942   :  { %v800_v24 = vpop.permute.xlu1 %799 }
 0x943   :  { %v805_v15 = vadd.f32 %v800_v24, %v2985_v36 }
 0x944   :  { %v802_v17 = vpop.permute.xlu0 %801 }
 0x945   :  { %v809_v20 = vadd.f32 %v807_v14, %v805_v15  ;;  %v806_v23 = vadd.f32 %v802_v17, %v2989_v40 }
 0x947   :  { %2451 = vtanh.f32 %v809_v20  ;;  %v810_v26 = vadd.f32 %v808_v18, %v806_v23 }
 0x949   :  { %2453 = vtanh.f32 %v810_v26 }
 0x951   :  { %v2452_v27 = vpop.eup %2451 }
 0x952   :  { %v813_v28 = vmul.f32 %v2452_v27, %v2996_v46 }
 0x953   :  { %v2454_v29 = vpop.eup %2453 }
 0x954   :  { %v815_v30 = vsel %vm148_vm0, %v813_v28, 0.0  ;;  %v814_v59 = vmul.f32 %v2454_v29, %v2996_v46 }
 0x955   :  { %816 = vadd.xlane.f32.xlu1 %v815_v30 }
 0x956   :  { %v818_v31 = vsel %vm148_vm0, %v814_v59, 0.0 }
 0x957   :  { %819 = vadd.xlane.f32.xlu0 %v818_v31 }
 0x9e2   :  { %v817_v32 = vpop.xlane.xlu1 %816 }
 0x9e3   :  { %v821_v33 = vadd.f32 %v817_v32, %v3005_v53 }
 0x9e4   :  { %v820_v34 = vpop.xlane.xlu0 %819 }
 0x9e5   :  { %v823_v37 = vsel %vm335_vm2, %v821_v33, -inf  ;;  %v822_v38 = vadd.f32 %v820_v34, %v3011_v56 }
 0x9e6   :  { %v824_v39 = vrot.slane %v823_v37, 4 }
 0x9e7   :  { %v830_v41 = vsel %vm335_vm2, %v822_v38, -inf }
 0x9e8   :  { %v825_v42 = vmax.f32 %v823_v37, %v824_v39  ;;  %v831_v43 = vrot.slane %v830_v41, 4  ;;  %v2396_v39 = vld [vmem:[%s3494_s9 + $0x8] sm:$0xff]  }
 0x9e9   :  { %2282 = vmatpush3.bf16.msra.mxu0 %v2396_v39 }
 0x9ea   :  { %v826_v44 = vrot.slane %v825_v42, 2  ;;  %v832_v45 = vmax.f32 %v830_v41, %v831_v43  ;;  %v766_v41 = vadd.f32 %v3021_v50, %v3113_v52  ;;  %2287 = vmatprep.subr.bf16.mxu0 %v2712_v57 }
 0x9ec   :  { %v827_v48 = vmax.f32 %v825_v42, %v826_v44  ;;  %v833_v49 = vrot.slane %v832_v45, 2  ;;  %v595_v42 = vpack.c.bf16 %v3106_v47, %v3106_v47 }
 0x9ee   :  { %v828_v51 = vrot.slane %v827_v48, 1  ;;  %v834_v54 = vmax.f32 %v832_v45, %v833_v49 }
 0x9f0   :  { %v829_v13 = vmax.f32 %v827_v48, %v828_v51  ;;  %v835_v60 = vrot.slane %v834_v54, 1  ;;  %v2397_v51 = vld [vmem:[#allocation8] sm:$0xff]  }
 0x9f2   :  { %v837_v62 = vsub.f32 %v821_v33, %v829_v13  ;;  %v836_v63 = vmax.f32 %v834_v54, %v835_v60 }
 0x9f4   :  { %v839_v8 = vmul.f32 1.442695, %v837_v62  ;;  %v838_v12 = vsub.f32 %v822_v38, %v836_v63 }
 0x9f6   :  { %2455 = vpow2.f32 %v839_v8  ;;  %v841_v9 = vmul.f32 1.442695, %v838_v12  ;;  %v2398_v12 = vld [vmem:[#allocation8 + $0x8] sm:$0xff]  }
 0x9f8   :  { %2457 = vpow2.f32 %v841_v9 }
 0xa00   :  { %v2456_v24 = vpop.eup %2455 }
 0xa01   :  { %v843_v14 = vsel %vm335_vm2, %v2456_v24, 0.0 }
 0xa02   :  { %v2458_v15 = vpop.eup %2457  ;;  %v844_v17 = vrot.slane %v843_v14, 4 }
 0xa03   :  { %v850_v18 = vsel %vm335_vm2, %v2458_v15, 0.0 }
 0xa04   :  { %v845_v20 = vadd.f32 %v844_v17, %v843_v14  ;;  %v851_v23 = vrot.slane %v850_v18, 4 }
 0xa06   :  { %v846_v26 = vrot.slane %v845_v20, 2  ;;  %v852_v27 = vadd.f32 %v851_v23, %v850_v18 }
 0xa08   :  { %v853_v28 = vrot.slane %v852_v27, 2  ;;  %v847_v29 = vadd.f32 %v846_v26, %v845_v20 }
 0xa0a   :  { %v848_v30 = vrot.slane %v847_v29, 1  ;;  %v854_v59 = vadd.f32 %v853_v28, %v852_v27 }
 0xa0c   :  { %v849_v31 = vadd.f32 %v848_v30, %v847_v29  ;;  %v855_v1 = vrot.slane %v854_v59, 1 }
 0xa0e   :  { %2459 = vrcp.f32 %v849_v31  ;;  %v856_v32 = vadd.f32 %v855_v1, %v854_v59  ;;  %v3185_v59 = vld [vmem:[%s3498_s13] ss:$0 sm:$0xff] }
 0xa10   :  { %2461 = vrcp.f32 %v856_v32 }
 0xa18   :  { %v2460_v33 = vpop.eup %2459 }
 0xa19   :  { %v858_v34 = vmul.f32 %v2460_v33, %v2456_v24 }
 0xa1a   :  { %v2462_v37 = vpop.eup %2461 }
 0xa1b   :  { %2181 = vst.msk [vmem:[%s3503_s18 + $0x10] sm:$0xff] %vm335_vm2, %v858_v34  ;;  %863 = vperm.xlu0 %2377, %v858_v34   ;;  %v860_v38 = vmul.f32 %v2462_v37, %v2458_v15  ;;  %v888_v37 = vld [vmem:[#allocation2 + $0x2] sm:$0x3] }
 0xa1d   :  { %868 = vperm.xlu1 %2378, %v860_v38   ;;  %2182 = vst.msk [vmem:[%s3503_s18 + $0x18] sm:$0xff] %vm335_vm2, %v860_v38 }
 0xa1f   :  { %965 = vrot.lane.b32.xlu0 %v766_v41, %s3524_s4 }
 0xa21   :  { %607 = vrot.lane.b32.xlu1 %v595_v42, %s2714_s25 }
 0xa9a   :  { %v3163_v43 = vpop.permute.xlu0 %863 }
 0xa9b   :  { %v871_v44 = vmul.f32 %v3163_v43, %v3045_v22 }
 0xa9c   :  { %v3167_v45 = vpop.permute.xlu1 %868 }
 0xa9d   :  { %v873_v48 = vsel %vm148_vm0, %v871_v44, 0.0  ;;  %v872_v52 = vmul.f32 %v3167_v45, %v3054_v61 }
 0xa9e   :  { %v874_v49 = vrot.slane %v873_v48, 4 }
 0xa9f   :  { %v880_v54 = vsel %vm148_vm0, %v872_v52, 0.0 }
 0xaa0   :  { %v875_v13 = vadd.f32 %v874_v49, %v873_v48  ;;  %v881_v60 = vrot.slane %v880_v54, 4  ;;  %v608_v62 = vpop.permute.xlu1 %607 }
 0xaa1   :  { %2284 = vmatmul.mubr.msk.bf16.vlgmr.msra.gmra.mrb[4].mxu0 %vm148_vm0, %v608_v62 }
 0xaa2   :  { %v876_v63 = vrot.slane %v875_v13, 2  ;;  %v882_v8 = vadd.f32 %v881_v60, %v880_v54  ;;  %2288 = vmatpush3.bf16.msra.mxu0 %v2397_v51  ;;  %2291 = vmatprep.mubr.msk.bf16.mxu0 %vm2713_vm3, %v2712_v57  ;;  %v966_v60 = vpop.permute.xlu0 %965 }
 0xaa3   :  { %2289 = vmatprep.subr.bf16.mxu0 %v2712_v57 }
 0xaa4   :  { %v877_v9 = vadd.f32 %v876_v63, %v875_v13  ;;  %v883_v24 = vrot.slane %v882_v8, 2 }
 0xaa6   :  { %v878_v14 = vrot.slane %v877_v9, 1  ;;  %v884_v15 = vadd.f32 %v883_v24, %v882_v8  ;;  %2290 = vmatpush3.bf16.msra.mxu0 %v2398_v12  ;;  %v2399_v12 = vld [vmem:[#allocation10] sm:$0xff]   ;;  %v767_v24 = vadd.f32 %v3070_v55, %v3117_v58 }
 0xaa7   :  { %2295 = vmatprep.subr.bf16.mxu0 %v2712_v57 }
 0xaa8   :  { %v879_v17 = vadd.f32 %v878_v14, %v877_v9  ;;  %v885_v18 = vrot.slane %v884_v15, 1  ;;  %v2400_v9 = vld [vmem:[#allocation10 + $0x8] sm:$0xff]  }
 0xaaa   :  { %v889_v20 = vpack.c.bf16 %v879_v17, %v879_v17  ;;  %v886_v23 = vadd.f32 %v885_v18, %v884_v15 }
 0xaac   :  { %v890_v26 = vpack.c.bf16 %v886_v23, %v886_v23  ;;  %v897_v27 = vunpack.c.l.b16 %v889_v20 }
 0xaae   :  { %v898_v28 = vunpack.c.l.b16 %v890_v26 }
 0xab0   :  { %v899_v29 = vsel %vm411_vm4, %v898_v28, %v897_v27 }
 0xab1   :  { %v900_v30 = vpack.c.b16 %v899_v29, %v899_v29 }
 0xab3   :  { %2292 = vmatmul.mubr.msk.bf16.vlgmr.msra.gmra.mrb[8].mxu0 %vm148_vm0, %v900_v30 }
 0xab4   :  { %2299 = vmatprep.mubr.msk.bf16.mxu0 %vm2713_vm3, %v2712_v57  ;;  %2296 = vmatpush3.bf16.msra.mxu0 %v2399_v12 }
 0xab5   :  { %2297 = vmatprep.subr.bf16.mxu0 %v2712_v57 }
 0xab8   :  { %2298 = vmatpush3.bf16.msra.mxu0 %v2400_v9 }
 0xab9   :  { %1197 = vmatprep.subr.bf16.mxu0 %v2905_v2 }
 0xb74   :  { %v658_v31 = vpop.f32.mrb[4].mxu0 }
 0xb75   :  { %v659_v1 = vadd.f32 %v3185_v59, %v658_v31  ;;  %v2285_v32 = vpop.f32.mrb[5].mxu0 }
 0xb76   :  { %v661_v33 = vpop.f32.mrb[6].mxu0 }
 0xb77   :  { %665 = vst.msk [vmem:[#allocation11] sm:$0x3] %vm664_vm5, %v659_v1  ;;  %v2286_v34 = vpop.f32.mrb[7].mxu0 }
 0xb86   :  { %v950_v38 = vpop.f32.mrb[8].mxu0 }
 0xb87   :  { %v956_v39 = vadd.f32 %v950_v38, %v888_v37  ;;  %v2293_v42 = vpop.f32.mrb[9].mxu0 }
 0xb88   :  { %v953_v44 = vpop.f32.mrb[10].mxu0 }
 0xb89   :  { %v957_v48 = vadd.f32 %v956_v39, %v766_v41  ;;  %v2294_v52 = vpop.f32.mrb[11].mxu0 }
 0xb8b   :  { %v2173_v49 = vmul.f32 -1.442695, %v957_v48 }
 0xb8d   :  { %2463 = vpow2.f32 %v2173_v49 }
 0xb97   :  { %v2464_v51 = vpop.eup %2463 }
 0xb98   :  { %v961_v54 = vadd.f32 1.0, %v2464_v51 }
 0xb9a   :  { %2465 = vrcp.f32 %v961_v54 }
 0xba4   :  { %v2466_v13 = vpop.eup %2465 }
 0xba5   :  { %v968_v62 = vmul.f32 %v2466_v13, %v966_v60  ;;  %v975_v14 = vsub.f32 1.0, %v2466_v13  ;;  %v981_v17 = vmul.f32 %v2466_v13, %v3080_v16 }
 0xba7   :  { %970 = vrot.lane.b32.xlu1 %v968_v62, %s3524_s4 }
 0xc19   :  { %v971_v63 = vpop.permute.xlu1 %970 }
 0xc1a   :  { %v973_v8 = vadd.f32 %v971_v63, %v956_v39 }
 0xc1c   :  { %2467 = vtanh.f32 %v973_v8  ;;  %v1279_v8 = vmul.f32 %v2983_v35, %v3163_v43 }
 0xc26   :  { %v2468_v41 = vpop.eup %2467 }
 0xc27   :  { %977 = vrot.lane.b32.xlu0 %v2468_v41, %s2714_s25  ;;  %v1280_v41 = vmul.f32 %v2983_v35, %v3167_v45  ;;  %v2401_v35 = vld [vmem:[%s3494_s9] sm:$0xff]  }
 0xc28   :  { %2304 = vmatpush3.bf16.msra.mxu1 %v2401_v35 }
 0xc29   :  { %2305 = vmatprep.subr.bf16.mxu1 %v2712_v57 }
 0xc2b   :  { %1054 = vrot.lane.b32.xlu0 %v767_v24, %s3524_s4 }
 0xc99   :  { %v978_v15 = vpop.permute.xlu0 %977 }
 0xc9a   :  { %v980_v18 = vmul.f32 %v978_v15, %v975_v14 }
 0xc9c   :  { %v3197_v20 = vadd.f32 %v981_v17, %v980_v18 }
 0xc9e   :  { %v983_v23 = vpack.c.bf16 %v3197_v20, %v3197_v20 }
 0xca0   :  { %989 = vrot.lane.b32.xlu1 %v983_v23, %s2714_s25 }
 0xd12   :  { %v990_v26 = vpop.permute.xlu1 %989 }
 0xd13   :  { %2300 = vmatmul.mubr.msk.bf16.vlgmr.msra.gmra.mrb[12].mxu0 %vm148_vm0, %v990_v26 }
 0xd14   :  { %1198 = vmatpush1.bf16.msra.mxu0 %v2910_v3  ;;  %1229 = vmatprep.mubr.bf16.mxu0 %v2710_v0 }
 0xd15   :  { %1199 = vmatprep.subr.bf16.mxu0 %v2915_v4 }
 0xd18   :  { %1200 = vmatpush1.bf16.msra.mxu0 %v2922_v5 }
 0xd19   :  { %1201 = vmatprep.subr.bf16.mxu0 %v2928_v6 }
 0xd1c   :  { %1202 = vmatpush1.bf16.msra.mxu0 %v2933_v7  ;;  %v1055_v7 = vpop.permute.xlu0 %1054 }
 0xd1d   :  { %1203 = vmatprep.subr.bf16.mxu0 %v2944_v10 }
 0xd20   :  { %1204 = vmatpush1.bf16.msra.mxu0 %v2951_v11 }
 0xd21   :  { %2327 = vmatprep.subr.bf16.mxu0 %v2712_v57 }
 0xde6   :  { %v1040_v2 = vpop.f32.mrb[12].mxu0 }
 0xde7   :  { %v1041_v16 = vadd.f32 %v3098_v19, %v1040_v2  ;;  %v2301_v3 = vpop.f32.mrb[13].mxu0 }
 0xde8   :  { %v1043_v58 = vpop.f32.mrb[14].mxu0 }
 0xde9   :  { %v1046_v27 = vadd.f32 %v1041_v16, %v767_v24  ;;  %v2302_v28 = vpop.f32.mrb[15].mxu0 }
 0xdeb   :  { %v2177_v4 = vmul.f32 -1.442695, %v1046_v27 }
 0xded   :  { %2469 = vpow2.f32 %v2177_v4 }
 0xdf7   :  { %v2470_v5 = vpop.eup %2469 }
 0xdf8   :  { %v1050_v29 = vadd.f32 1.0, %v2470_v5 }
 0xdfa   :  { %2471 = vrcp.f32 %v1050_v29 }
 0xe04   :  { %v2472_v6 = vpop.eup %2471 }
 0xe05   :  { %v1057_v30 = vmul.f32 %v2472_v6, %v1055_v7  ;;  %v1064_v1 = vsub.f32 1.0, %v2472_v6  ;;  %v1070_v33 = vmul.f32 %v2472_v6, %v3106_v47 }
 0xe07   :  { %1059 = vrot.lane.b32.xlu1 %v1057_v30, %s3524_s4 }
 0xe0b   :  { %1141 = vrot.lane.b32.xlu1 %v3197_v20, %s2714_s25 }
 0xe79   :  { %v1060_v10 = vpop.permute.xlu1 %1059 }
 0xe7a   :  { %v1062_v11 = vadd.f32 %v1060_v10, %v1041_v16 }
 0xe7c   :  { %2473 = vtanh.f32 %v1062_v11 }
 0xe7d   :  { %v1142_v38 = vpop.permute.xlu1 %1141 }
 0xe86   :  { %v2474_v31 = vpop.eup %2473 }
 0xe87   :  { %1066 = vrot.lane.b32.xlu0 %v2474_v31, %s2714_s25 }
 0xef9   :  { %v1067_v32 = vpop.permute.xlu0 %1066 }
 0xefa   :  { %v1069_v34 = vmul.f32 %v1067_v32, %v1064_v1 }
 0xefc   :  { %v3218_v37 = vadd.f32 %v1070_v33, %v1069_v34 }
 0xefe   :  { %v1144_v39 = vsel %vm148_vm0, %v1142_v38, %v3218_v37 }
 0xeff   :  { %v1145_v42 = vpack.c.bf16 %v1144_v39, %v1144_v39 }
 0xf01   :  { %2191 = vmatmul.mubr.msk.bf16.vlgmr.msra.gmra.mrb[16].mxu0 %vm199_vm1, %v1145_v42 }
 0xf02   :  { %2331 = vmatprep.mubr.msk.bf16.mxu0 %vm2713_vm3, %v2712_v57 }
 0xfd4   :  { %v3225_v44 = vpop.f32.mrb[16].mxu0 }
 0xfd5   :  { %v1247_v48 = vrot.slane %v3225_v44, %v2964_v21  ;;  %v3229_v52 = vpop.f32.mrb[17].mxu0 }
 0xfd6   :  { %v1235_v47 = vpop.f32.mrb[18].mxu0 }
 0xfd7   :  { %v1248_v49 = vcombine.high %v1247_v48, %v1247_v48  ;;  %v1236_v51 = vpop.f32.mrb[19].mxu0  ;;  %v1255_v54 = vrot.slane %v1247_v48, %v2964_v21 }
 0xfd9   :  { %v1266_v13 = vrot.slane %v1255_v54, %v2972_v25  ;;  %v1262_v60 = vrot.slane %v1248_v49, %v2964_v21 }
 0xfdb   :  { %1271 = vrot.lane.b32.xlu0 %v1266_v13, %s3523_s27  ;;  %v1270_v62 = vrot.slane %v1262_v60, %v2972_v25 }
 0xfdd   :  { %1273 = vrot.lane.b32.xlu1 %v1270_v62, %s3523_s27 }
0x104d   :  { %v1272_v63 = vpop.permute.xlu0 %1271 }
0x104e   :  { %v1277_v12 = vadd.f32 %v1272_v63, %v2985_v36 }
0x104f   :  { %v1274_v9 = vpop.permute.xlu1 %1273 }
0x1050   :  { %v1281_v24 = vadd.f32 %v1279_v8, %v1277_v12  ;;  %v1278_v14 = vadd.f32 %v1274_v9, %v2989_v40 }
0x1052   :  { %2475 = vtanh.f32 %v1281_v24  ;;  %v1282_v15 = vadd.f32 %v1280_v41, %v1278_v14  ;;  %v2402_v14 = vld [vmem:[%s3494_s9 + $0x8] sm:$0xff]  }
0x1053   :  { %2306 = vmatpush3.bf16.msra.mxu1 %v2402_v14  ;;  %v1239_v14 = vadd.f32 %v3070_v55, %v3229_v52 }
0x1054   :  { %2477 = vtanh.f32 %v1282_v15  ;;  %2311 = vmatprep.subr.bf16.mxu1 %v2712_v57 }
0x105c   :  { %v2476_v17 = vpop.eup %2475 }
0x105d   :  { %v1285_v18 = vmul.f32 %v2476_v17, %v2996_v46  ;;  %v1072_v17 = vpack.c.bf16 %v3218_v37, %v3218_v37 }
0x105e   :  { %v2478_v23 = vpop.eup %2477 }
0x105f   :  { %v1287_v26 = vsel %vm148_vm0, %v1285_v18, 0.0  ;;  %v1286_v43 = vmul.f32 %v2478_v23, %v2996_v46  ;;  %v1238_v18 = vadd.f32 %v3021_v50, %v3225_v44 }
0x1060   :  { %1288 = vadd.xlane.f32.xlu0 %v1287_v26 }
0x1061   :  { %v1290_v36 = vsel %vm148_vm0, %v1286_v43, 0.0 }
0x1062   :  { %1291 = vadd.xlane.f32.xlu1 %v1290_v36  ;;  %v2403_v36 = vld [vmem:[#allocation8] sm:$0xff]  }
0x10ed   :  { %v1289_v40 = vpop.xlane.xlu0 %1288 }
0x10ee   :  { %v1293_v45 = vadd.f32 %v1289_v40, %v3005_v53 }
0x10ef   :  { %v1292_v2 = vpop.xlane.xlu1 %1291 }
0x10f0   :  { %v1295_v16 = vsel %vm335_vm2, %v1293_v45, -inf  ;;  %v1294_v3 = vadd.f32 %v1292_v2, %v3011_v56 }
0x10f1   :  { %v1296_v46 = vrot.slane %v1295_v16, 4 }
0x10f2   :  { %v1302_v58 = vsel %vm335_vm2, %v1294_v3, -inf }
0x10f3   :  { %v1297_v27 = vmax.f32 %v1295_v16, %v1296_v46  ;;  %v1303_v28 = vrot.slane %v1302_v58, 4 }
0x10f5   :  { %v1298_v4 = vrot.slane %v1297_v27, 2  ;;  %v1304_v5 = vmax.f32 %v1302_v58, %v1303_v28 }
0x10f7   :  { %v1299_v29 = vmax.f32 %v1297_v27, %v1298_v4  ;;  %v1305_v6 = vrot.slane %v1304_v5, 2 }
0x10f9   :  { %v1300_v7 = vrot.slane %v1299_v29, 1  ;;  %v1306_v30 = vmax.f32 %v1304_v5, %v1305_v6 }
0x10fb   :  { %v1301_v10 = vmax.f32 %v1299_v29, %v1300_v7  ;;  %v1307_v11 = vrot.slane %v1306_v30, 1 }
0x10fd   :  { %v1309_v31 = vsub.f32 %v1293_v45, %v1301_v10  ;;  %v1308_v53 = vmax.f32 %v1306_v30, %v1307_v11 }
0x10ff   :  { %v1311_v1 = vmul.f32 1.442695, %v1309_v31  ;;  %v1310_v32 = vsub.f32 %v1294_v3, %v1308_v53  ;;  %v2404_v3 = vld [vmem:[#allocation8 + $0x8] sm:$0xff]  }
0x1101   :  { %2479 = vpow2.f32 %v1311_v1  ;;  %v1313_v33 = vmul.f32 1.442695, %v1310_v32 }
0x1103   :  { %2481 = vpow2.f32 %v1313_v33 }
0x110b   :  { %v2480_v56 = vpop.eup %2479 }
0x110c   :  { %v1315_v34 = vsel %vm335_vm2, %v2480_v56, 0.0 }
0x110d   :  { %v2482_v38 = vpop.eup %2481  ;;  %v1316_v39 = vrot.slane %v1315_v34, 4 }
0x110e   :  { %v1322_v42 = vsel %vm335_vm2, %v2482_v38, 0.0 }
0x110f   :  { %v1317_v48 = vadd.f32 %v1316_v39, %v1315_v34  ;;  %v1323_v47 = vrot.slane %v1322_v42, 4  ;;  %v1360_v34 = vld [vmem:[#allocation2 + $0x4] sm:$0x3] }
0x1111   :  { %v1318_v49 = vrot.slane %v1317_v48, 2  ;;  %v1324_v51 = vadd.f32 %v1323_v47, %v1322_v42 }
0x1113   :  { %v1325_v54 = vrot.slane %v1324_v51, 2  ;;  %v1319_v13 = vadd.f32 %v1318_v49, %v1317_v48 }
0x1115   :  { %v1320_v60 = vrot.slane %v1319_v13, 1  ;;  %v1326_v62 = vadd.f32 %v1325_v54, %v1324_v51 }
0x1117   :  { %v1321_v63 = vadd.f32 %v1320_v60, %v1319_v13  ;;  %v1327_v8 = vrot.slane %v1326_v62, 1 }
0x1119   :  { %2483 = vrcp.f32 %v1321_v63  ;;  %v1328_v12 = vadd.f32 %v1327_v8, %v1326_v62 }
0x111b   :  { %2485 = vrcp.f32 %v1328_v12 }
0x1123   :  { %v2484_v9 = vpop.eup %2483 }
0x1124   :  { %v1330_v41 = vmul.f32 %v2484_v9, %v2480_v56  ;;  %v2405_v9 = vld [vmem:[#allocation10] sm:$0xff]  }
0x1125   :  { %v2486_v24 = vpop.eup %2485 }
0x1126   :  { %1335 = vperm.xlu0 %2377, %v1330_v41   ;;  %2203 = vst.msk [vmem:[%s3503_s18 + $0x20] sm:$0xff] %vm335_vm2, %v1330_v41  ;;  %v1332_v15 = vmul.f32 %v2486_v24, %v2482_v38  ;;  %v2406_v41 = vld [vmem:[#allocation10 + $0x8] sm:$0xff]  }
0x1128   :  { %1340 = vperm.xlu1 %2378, %v1332_v15   ;;  %2204 = vst.msk [vmem:[%s3503_s18 + $0x28] sm:$0xff] %vm335_vm2, %v1332_v15 }
0x112a   :  { %1078 = vrot.lane.b32.xlu0 %v1072_v17, %s2714_s25 }
0x112c   :  { %1437 = vrot.lane.b32.xlu1 %v1238_v18, %s3524_s4 }
0x11a5   :  { %v3275_v23 = vpop.permute.xlu0 %1335 }
0x11a6   :  { %v1343_v26 = vmul.f32 %v3275_v23, %v3045_v22 }
0x11a7   :  { %v3279_v43 = vpop.permute.xlu1 %1340 }
0x11a8   :  { %v1345_v35 = vsel %vm148_vm0, %v1343_v26, 0.0  ;;  %v1344_v40 = vmul.f32 %v3279_v43, %v3054_v61 }
0x11a9   :  { %v1346_v45 = vrot.slane %v1345_v35, 4  ;;  %v1079_v2 = vpop.permute.xlu0 %1078 }
0x11aa   :  { %v1352_v16 = vsel %vm148_vm0, %v1344_v40, 0.0  ;;  %2308 = vmatmul.mubr.msk.bf16.vlgmr.msra.gmra.mrb[12].mxu1 %vm148_vm0, %v1079_v2 }
0x11ab   :  { %v1347_v50 = vadd.f32 %v1346_v45, %v1345_v35  ;;  %v1353_v44 = vrot.slane %v1352_v16, 4  ;;  %2312 = vmatpush3.bf16.msra.mxu1 %v2403_v36  ;;  %2315 = vmatprep.mubr.msk.bf16.mxu1 %vm2713_vm3, %v2712_v57  ;;  %v1438_v62 = vpop.permute.xlu1 %1437 }
0x11ac   :  { %2313 = vmatprep.subr.bf16.mxu1 %v2712_v57 }
0x11ad   :  { %v1348_v22 = vrot.slane %v1347_v50, 2  ;;  %v1354_v46 = vadd.f32 %v1353_v44, %v1352_v16 }
0x11af   :  { %v1349_v58 = vadd.f32 %v1348_v22, %v1347_v50  ;;  %v1355_v27 = vrot.slane %v1354_v46, 2  ;;  %2314 = vmatpush3.bf16.msra.mxu1 %v2404_v3 }
0x11b0   :  { %2319 = vmatprep.subr.bf16.mxu1 %v2712_v57 }
0x11b1   :  { %v1350_v61 = vrot.slane %v1349_v58, 1  ;;  %v1356_v28 = vadd.f32 %v1355_v27, %v1354_v46  ;;  %v2412_v27 = vld [vmem:[%s3491_s6 + $0x14] ss:$8 sps:$4 sm:$0xff]  }
0x11b3   :  { %v1351_v4 = vadd.f32 %v1350_v61, %v1349_v58  ;;  %v1357_v5 = vrot.slane %v1356_v28, 1  ;;  %v2410_v61 = vld [vmem:[%s3491_s6 + $0x10] ss:$8 sps:$4 sm:$0xff]  }
0x11b5   :  { %v1361_v29 = vpack.c.bf16 %v1351_v4, %v1351_v4  ;;  %v1358_v6 = vadd.f32 %v1357_v5, %v1356_v28  ;;  %v2415_v28 = vld [vmem:[%s3491_s6 + $0x24] ss:$8 sps:$4 sm:$0xff]   ;;  %v2413_v4 = vld [vmem:[%s3491_s6 + $0x20] ss:$8 sps:$4 sm:$0xff]  }
0x11b7   :  { %v1362_v7 = vpack.c.bf16 %v1358_v6, %v1358_v6  ;;  %v1369_v30 = vunpack.c.l.b16 %v1361_v29  ;;  %v2418_v6 = vld [vmem:[%s3491_s6 + $0x34] ss:$8 sps:$4 sm:$0xff]  }
0x11b9   :  { %v1370_v10 = vunpack.c.l.b16 %v1362_v7  ;;  %v2416_v7 = vld [vmem:[%s3491_s6 + $0x30] ss:$8 sps:$4 sm:$0xff]  }
0x11bb   :  { %v1371_v11 = vsel %vm411_vm4, %v1370_v10, %v1369_v30 }
0x11bc   :  { %v1372_v31 = vpack.c.b16 %v1371_v11, %v1371_v11 }
0x11be   :  { %2316 = vmatmul.mubr.msk.bf16.vlgmr.msra.gmra.mrb[16].mxu1 %vm148_vm0, %v1372_v31 }
0x11bf   :  { %2323 = vmatprep.mubr.msk.bf16.mxu1 %vm2713_vm3, %v2712_v57  ;;  %2320 = vmatpush3.bf16.msra.mxu1 %v2405_v9 }
0x11c0   :  { %2321 = vmatprep.subr.bf16.mxu1 %v2712_v57 }
0x11c3   :  { %2322 = vmatpush3.bf16.msra.mxu1 %v2406_v41 }
0x127d   :  { %v1129_v53 = vpop.f32.mrb[12].mxu1 }
0x127e   :  { %v1130_v1 = vadd.f32 %v3185_v59, %v1129_v53  ;;  %v2309_v32 = vpop.f32.mrb[13].mxu1 }
0x127f   :  { %v1132_v33 = vpop.f32.mrb[14].mxu1 }
0x1280   :  { %1136 = vst.msk [vmem:[#allocation11 + $0x2] sm:$0x3] %vm664_vm5, %v1130_v1  ;;  %v2310_v56 = vpop.f32.mrb[15].mxu1 }
0x1291   :  { %v1422_v38 = vpop.f32.mrb[16].mxu1 }
0x1292   :  { %v1428_v39 = vadd.f32 %v1422_v38, %v1360_v34  ;;  %v2317_v42 = vpop.f32.mrb[17].mxu1 }
0x1293   :  { %v1425_v48 = vpop.f32.mrb[18].mxu1 }
0x1294   :  { %v1429_v47 = vadd.f32 %v1428_v39, %v1238_v18  ;;  %v2318_v49 = vpop.f32.mrb[19].mxu1 }
0x1296   :  { %v2195_v51 = vmul.f32 -1.442695, %v1429_v47 }
0x1298   :  { %2487 = vpow2.f32 %v2195_v51 }
0x12a2   :  { %v2488_v54 = vpop.eup %2487 }
0x12a3   :  { %v1433_v13 = vadd.f32 1.0, %v2488_v54 }
0x12a5   :  { %2489 = vrcp.f32 %v1433_v13 }
0x12af   :  { %v2490_v60 = vpop.eup %2489 }
0x12b0   :  { %v1440_v63 = vmul.f32 %v2490_v60, %v1438_v62  ;;  %v1447_v15 = vsub.f32 1.0, %v2490_v60  ;;  %v1453_v18 = vmul.f32 %v2490_v60, %v3197_v20  ;;  %v2523_v60 = vld [vmem:[%s3499_s14] ss:$0 sm:$0xff] }
0x12b1   :  { %v1751_v62 = vmul.f32 %v2523_v60, %v3275_v23  ;;  %v1752_v9 = vmul.f32 %v2523_v60, %v3279_v43  ;;  %v2419_v43 = vld [vmem:[%s3494_s9] sm:$0xff]  }
0x12b2   :  { %1442 = vrot.lane.b32.xlu0 %v1440_v63, %s3524_s4  ;;  %v2524_v63 = vld [vmem:[#allocation7] sm:$0xff]  ;;  %2328 = vmatpush3.bf16.msra.mxu0 %v2419_v43 }
0x12b3   :  { %2329 = vmatprep.subr.bf16.mxu0 %v2712_v57 }
0x1324   :  { %v1443_v8 = vpop.permute.xlu0 %1442 }
0x1325   :  { %v1445_v12 = vadd.f32 %v1443_v8, %v1428_v39 }
0x1327   :  { %2491 = vtanh.f32 %v1445_v12 }
0x1331   :  { %v2492_v24 = vpop.eup %2491 }
0x1332   :  { %1449 = vrot.lane.b32.xlu1 %v2492_v24, %s2714_s25 }
0x1336   :  { %1526 = vrot.lane.b32.xlu1 %v1239_v14, %s3524_s4 }
0x13a4   :  { %v1450_v17 = vpop.permute.xlu1 %1449 }
0x13a5   :  { %v1452_v26 = vmul.f32 %v1450_v17, %v1447_v15  ;;  %v2526_v15 = vld [vmem:[%s3500_s15] ss:$0 sm:$0xff] }
0x13a7   :  { %v3303_v36 = vadd.f32 %v1453_v18, %v1452_v26 }
0x13a8   :  { %v1527_v46 = vpop.permute.xlu1 %1526 }
0x13a9   :  { %v1455_v35 = vpack.c.bf16 %v3303_v36, %v3303_v36 }
0x13ab   :  { %1461 = vrot.lane.b32.xlu0 %v1455_v35, %s2714_s25 }
0x141d   :  { %v1462_v40 = vpop.permute.xlu0 %1461 }
0x141e   :  { %2324 = vmatmul.mubr.msk.bf16.vlgmr.msra.gmra.mrb[20].mxu1 %vm148_vm0, %v1462_v40 }
0x141f   :  { %1701 = vmatprep.mubr.bf16.mxu1 %v2710_v0  ;;  %v2407_v0 = vld [vmem:[%s3491_s6] ss:$8 sps:$4 sm:$0xff]  }
0x14f1   :  { %v1512_v55 = vpop.f32.mrb[20].mxu1 }
0x14f2   :  { %v1513_v52 = vadd.f32 %v3098_v19, %v1512_v55  ;;  %v2325_v45 = vpop.f32.mrb[21].mxu1  ;;  %v2409_v19 = vld [vmem:[%s3491_s6 + $0x4] ss:$8 sps:$4 sm:$0xff]  }
0x14f3   :  { %v1515_v2 = vpop.f32.mrb[22].mxu1  ;;  %1669 = vmatprep.subr.bf16.mxu1 %v2409_v19  ;;  %v2527_v55 = vld [vmem:[%s3490_s5] sm:$0xff] }
0x14f4   :  { %v1518_v16 = vadd.f32 %v1513_v52, %v1239_v14  ;;  %v2326_v20 = vpop.f32.mrb[23].mxu1  ;;  %1670 = vmatpush1.bf16.msra.mxu1 %v2407_v0 }
0x14f5   :  { %1671 = vmatprep.subr.bf16.mxu1 %v2412_v27 }
0x14f6   :  { %v2199_v50 = vmul.f32 -1.442695, %v1518_v16  ;;  %v2528_v16 = vld [vmem:[%s3490_s5 + $0x8] sm:$0xff] }
0x14f8   :  { %2493 = vpow2.f32 %v2199_v50  ;;  %1672 = vmatpush1.bf16.msra.mxu1 %v2410_v61 }
0x14f9   :  { %1673 = vmatprep.subr.bf16.mxu1 %v2415_v28 }
0x14fc   :  { %1674 = vmatpush1.bf16.msra.mxu1 %v2413_v4 }
0x14fd   :  { %1675 = vmatprep.subr.bf16.mxu1 %v2418_v6 }
0x1500   :  { %1676 = vmatpush1.bf16.msra.mxu1 %v2416_v7 }
0x1501   :  { %2351 = vmatprep.subr.bf16.mxu1 %v2712_v57 }
0x1502   :  { %v2494_v44 = vpop.eup %2493 }
0x1503   :  { %v1522_v3 = vadd.f32 1.0, %v2494_v44 }
0x1505   :  { %2495 = vrcp.f32 %v1522_v3 }
0x150f   :  { %v2496_v22 = vpop.eup %2495 }
0x1510   :  { %v1529_v58 = vmul.f32 %v2496_v22, %v1527_v46  ;;  %v1536_v10 = vsub.f32 1.0, %v2496_v22  ;;  %v1542_v31 = vmul.f32 %v2496_v22, %v3218_v37 }
0x1512   :  { %1531 = vrot.lane.b32.xlu0 %v1529_v58, %s3524_s4 }
0x1516   :  { %1613 = vrot.lane.b32.xlu0 %v3303_v36, %s2714_s25 }
0x1584   :  { %v1532_v5 = vpop.permute.xlu0 %1531 }
0x1585   :  { %v1534_v29 = vadd.f32 %v1532_v5, %v1513_v52 }
0x1587   :  { %2497 = vtanh.f32 %v1534_v29 }
0x1588   :  { %v1614_v32 = vpop.permute.xlu0 %1613 }
0x1591   :  { %v2498_v30 = vpop.eup %2497 }
0x1592   :  { %1538 = vrot.lane.b32.xlu1 %v2498_v30, %s2714_s25 }
0x1604   :  { %v1539_v11 = vpop.permute.xlu1 %1538 }
0x1605   :  { %v1541_v53 = vmul.f32 %v1539_v11, %v1536_v10 }
0x1607   :  { %v3341_v1 = vadd.f32 %v1542_v31, %v1541_v53 }
0x1609   :  { %v1616_v33 = vsel %vm148_vm0, %v1614_v32, %v3341_v1 }
0x160a   :  { %v1617_v56 = vpack.c.bf16 %v1616_v33, %v1616_v33 }
0x160c   :  { %2213 = vmatmul.mubr.msk.bf16.vlgmr.msra.gmra.mrb[24].mxu1 %vm199_vm1, %v1617_v56 }
0x160d   :  { %2355 = vmatprep.mubr.msk.bf16.mxu1 %vm2713_vm3, %v2712_v57 }
0x16df   :  { %v3348_v34 = vpop.f32.mrb[24].mxu1 }
0x16e0   :  { %v1719_v38 = vrot.slane %v3348_v34, %v2964_v21  ;;  %v3352_v39 = vpop.f32.mrb[25].mxu1 }
0x16e1   :  { %v1707_v37 = vpop.f32.mrb[26].mxu1 }
0x16e2   :  { %v1720_v42 = vcombine.high %v1719_v38, %v1719_v38  ;;  %v1708_v48 = vpop.f32.mrb[27].mxu1  ;;  %v1727_v47 = vrot.slane %v1719_v38, %v2964_v21 }
0x16e4   :  { %v1738_v49 = vrot.slane %v1727_v47, %v2972_v25  ;;  %v1734_v51 = vrot.slane %v1720_v42, %v2964_v21  ;;  %v2525_v21 = vld [vmem:[#allocation7 + $0x8] sm:$0xff] }
0x16e6   :  { %1743 = vrot.lane.b32.xlu1 %v1738_v49, %s3523_s27  ;;  %v1742_v54 = vrot.slane %v1734_v51, %v2972_v25 }
0x16e8   :  { %1745 = vrot.lane.b32.xlu0 %v1742_v54, %s3523_s27 }
0x1758   :  { %v1744_v13 = vpop.permute.xlu1 %1743 }
0x1759   :  { %v1749_v8 = vadd.f32 %v2524_v63, %v1744_v13 }
0x175a   :  { %v1746_v12 = vpop.permute.xlu0 %1745 }
0x175b   :  { %v1753_v41 = vadd.f32 %v1751_v62, %v1749_v8  ;;  %v1750_v24 = vadd.f32 %v2525_v21, %v1746_v12  ;;  %v2420_v12 = vld [vmem:[%s3494_s9 + $0x8] sm:$0xff]   ;;  %v1544_v21 = vpack.c.bf16 %v3341_v1, %v3341_v1 }
0x175c   :  { %2330 = vmatpush3.bf16.msra.mxu0 %v2420_v12 }
0x175d   :  { %2499 = vtanh.f32 %v1753_v41  ;;  %v1754_v14 = vadd.f32 %v1752_v9, %v1750_v24  ;;  %v2529_v9 = vld [vmem:[%s3495_s10] ss:$0 sm:$0xff]  ;;  %2335 = vmatprep.subr.bf16.mxu0 %v2712_v57 }
0x175e   :  { %v1710_v41 = vadd.f32 %v2529_v9, %v3348_v34  ;;  %v2531_v34 = vld [vmem:[%s3488_s3 + $0x8] sm:$0xff] }
0x175f   :  { %2501 = vtanh.f32 %v1754_v14  ;;  %v2530_v14 = vld [vmem:[%s3488_s3] sm:$0xff] }
0x1767   :  { %v2500_v25 = vpop.eup %2499 }
0x1768   :  { %v1757_v17 = vmul.f32 %v2526_v15, %v2500_v25 }
0x1769   :  { %v2502_v18 = vpop.eup %2501 }
0x176a   :  { %v1759_v23 = vsel %vm148_vm0, %v1757_v17, 0.0  ;;  %v1758_v26 = vmul.f32 %v2526_v15, %v2502_v18 }
0x176b   :  { %1760 = vadd.xlane.f32.xlu1 %v1759_v23 }
0x176c   :  { %v1762_v35 = vsel %vm148_vm0, %v1758_v26, 0.0  ;;  %v2421_v26 = vld [vmem:[#allocation8] sm:$0xff]  }
0x176d   :  { %1763 = vadd.xlane.f32.xlu0 %v1762_v35 }
0x17f8   :  { %v1761_v40 = vpop.xlane.xlu1 %1760 }
0x17f9   :  { %v1765_v52 = vadd.f32 %v2527_v55, %v1761_v40 }
0x17fa   :  { %v1764_v45 = vpop.xlane.xlu0 %1763 }
0x17fb   :  { %v1767_v2 = vsel %vm335_vm2, %v1765_v52, -inf  ;;  %v1766_v20 = vadd.f32 %v2528_v16, %v1764_v45 }
0x17fc   :  { %v1768_v50 = vrot.slane %v1767_v2, 4 }
0x17fd   :  { %v1774_v44 = vsel %vm335_vm2, %v1766_v20, -inf }
0x17fe   :  { %v1769_v3 = vmax.f32 %v1767_v2, %v1768_v50  ;;  %v1775_v22 = vrot.slane %v1774_v44, 4  ;;  %v2422_v2 = vld [vmem:[#allocation8 + $0x8] sm:$0xff]  }
0x1800   :  { %v1770_v46 = vrot.slane %v1769_v3, 2  ;;  %v1776_v58 = vmax.f32 %v1774_v44, %v1775_v22 }
0x1802   :  { %v1771_v0 = vmax.f32 %v1769_v3, %v1770_v46  ;;  %v1777_v19 = vrot.slane %v1776_v58, 2 }
0x1804   :  { %v1772_v27 = vrot.slane %v1771_v0, 1  ;;  %v1778_v61 = vmax.f32 %v1776_v58, %v1777_v19 }
0x1806   :  { %v1773_v28 = vmax.f32 %v1771_v0, %v1772_v27  ;;  %v1779_v4 = vrot.slane %v1778_v61, 1 }
0x1808   :  { %v1781_v5 = vsub.f32 %v1765_v52, %v1773_v28  ;;  %v1780_v29 = vmax.f32 %v1778_v61, %v1779_v4 }
0x180a   :  { %v1783_v6 = vmul.f32 1.442695, %v1781_v5  ;;  %v1782_v7 = vsub.f32 %v1766_v20, %v1780_v29 }
0x180c   :  { %2503 = vpow2.f32 %v1783_v6  ;;  %v1785_v30 = vmul.f32 1.442695, %v1782_v7 }
0x180e   :  { %2505 = vpow2.f32 %v1785_v30  ;;  %v1832_v30 = vld [vmem:[#allocation2 + $0x6] sm:$0x3] }
0x1816   :  { %v2504_v10 = vpop.eup %2503 }
0x1817   :  { %v1787_v11 = vsel %vm335_vm2, %v2504_v10, 0.0 }
0x1818   :  { %v2506_v31 = vpop.eup %2505  ;;  %v1788_v53 = vrot.slane %v1787_v11, 4 }
0x1819   :  { %v1794_v32 = vsel %vm335_vm2, %v2506_v31, 0.0 }
0x181a   :  { %v1789_v33 = vadd.f32 %v1788_v53, %v1787_v11  ;;  %v1795_v56 = vrot.slane %v1794_v32, 4 }
0x181c   :  { %v1790_v38 = vrot.slane %v1789_v33, 2  ;;  %v1796_v37 = vadd.f32 %v1795_v56, %v1794_v32 }
0x181e   :  { %v1797_v42 = vrot.slane %v1796_v37, 2  ;;  %v1791_v48 = vadd.f32 %v1790_v38, %v1789_v33 }
0x1820   :  { %v1792_v47 = vrot.slane %v1791_v48, 1  ;;  %v1798_v49 = vadd.f32 %v1797_v42, %v1796_v37 }
0x1822   :  { %v1793_v51 = vadd.f32 %v1792_v47, %v1791_v48  ;;  %v1799_v54 = vrot.slane %v1798_v49, 1 }
0x1824   :  { %2507 = vrcp.f32 %v1793_v51  ;;  %v1800_v13 = vadd.f32 %v1799_v54, %v1798_v49  ;;  %v2423_v51 = vld [vmem:[#allocation10] sm:$0xff]   ;;  %v2424_v54 = vld [vmem:[#allocation10 + $0x8] sm:$0xff]  }
0x1826   :  { %2509 = vrcp.f32 %v1800_v13 }
0x182e   :  { %v2508_v60 = vpop.eup %2507 }
0x182f   :  { %v1802_v62 = vmul.f32 %v2508_v60, %v2504_v10  ;;  %v2532_v60 = vld [vmem:[%s3497_s12] ss:$0 sm:$0xff] }
0x1830   :  { %v2510_v63 = vpop.eup %2509 }
0x1831   :  { %2225 = vst.msk [vmem:[%s3503_s18 + $0x30] sm:$0xff] %vm335_vm2, %v1802_v62  ;;  %1807 = vperm.xlu0 %2377, %v1802_v62   ;;  %v1804_v8 = vmul.f32 %v2510_v63, %v2506_v31  ;;  %v1711_v62 = vadd.f32 %v2532_v60, %v3352_v39 }
0x1833   :  { %1812 = vperm.xlu1 %2378, %v1804_v8   ;;  %2226 = vst.msk [vmem:[%s3503_s18 + $0x38] sm:$0xff] %vm335_vm2, %v1804_v8 }
0x1835   :  { %1909 = vrot.lane.b32.xlu0 %v1710_v41, %s3524_s4 }
0x1837   :  { %1550 = vrot.lane.b32.xlu1 %v1544_v21, %s2714_s25 }
0x18b0   :  { %v1808_v24 = vpop.permute.xlu0 %1807 }
0x18b1   :  { %v1815_v25 = vmul.f32 %v2530_v14, %v1808_v24 }
0x18b2   :  { %v1813_v15 = vpop.permute.xlu1 %1812 }
0x18b3   :  { %v1817_v17 = vsel %vm148_vm0, %v1815_v25, 0.0  ;;  %v1816_v18 = vmul.f32 %v2531_v34, %v1813_v15  ;;  %v2533_v25 = vld [vmem:[%s3496_s11] ss:$0 sm:$0xff] }
0x18b4   :  { %v1818_v23 = vrot.slane %v1817_v17, 4  ;;  %v1910_v48 = vpop.permute.xlu0 %1909 }
0x18b5   :  { %v1824_v35 = vsel %vm148_vm0, %v1816_v18, 0.0 }
0x18b6   :  { %v1819_v43 = vadd.f32 %v1818_v23, %v1817_v17  ;;  %v1825_v40 = vrot.slane %v1824_v35, 4  ;;  %v1551_v55 = vpop.permute.xlu1 %1550 }
0x18b7   :  { %2332 = vmatmul.mubr.msk.bf16.vlgmr.msra.gmra.mrb[20].mxu0 %vm148_vm0, %v1551_v55 }
0x18b8   :  { %v1820_v52 = vrot.slane %v1819_v43, 2  ;;  %v1826_v45 = vadd.f32 %v1825_v40, %v1824_v35  ;;  %2336 = vmatpush3.bf16.msra.mxu0 %v2421_v26  ;;  %2339 = vmatprep.mubr.msk.bf16.mxu0 %vm2713_vm3, %v2712_v57 }
0x18b9   :  { %2337 = vmatprep.subr.bf16.mxu0 %v2712_v57 }
0x18ba   :  { %v1821_v16 = vadd.f32 %v1820_v52, %v1819_v43  ;;  %v1827_v20 = vrot.slane %v1826_v45, 2 }
0x18bc   :  { %v1822_v50 = vrot.slane %v1821_v16, 1  ;;  %v1828_v44 = vadd.f32 %v1827_v20, %v1826_v45  ;;  %2338 = vmatpush3.bf16.msra.mxu0 %v2422_v2  ;;  %v2425_v45 = vld [vmem:[%s3494_s9] sm:$0xff]  }
0x18bd   :  { %2343 = vmatprep.subr.bf16.mxu0 %v2712_v57  ;;  %2352 = vmatpush3.bf16.msra.mxu1 %v2425_v45 }
0x18be   :  { %v1823_v3 = vadd.f32 %v1822_v50, %v1821_v16  ;;  %v1829_v22 = vrot.slane %v1828_v44, 1  ;;  %v2426_v16 = vld [vmem:[%s3494_s9 + $0x8] sm:$0xff]   ;;  %2353 = vmatprep.subr.bf16.mxu1 %v2712_v57  ;;  %s2715_s9 = smov [#allocation12]  }
0x18c0   :  { %v1833_v46 = vpack.c.bf16 %v1823_v3, %v1823_v3  ;;  %v1830_v58 = vadd.f32 %v1829_v22, %v1828_v44 }
0x18c1   :  { %2354 = vmatpush3.bf16.msra.mxu1 %v2426_v16 }
0x18c2   :  { %v1834_v0 = vpack.c.bf16 %v1830_v58, %v1830_v58  ;;  %v1841_v19 = vunpack.c.l.b16 %v1833_v46 }
0x18c4   :  { %v1842_v27 = vunpack.c.l.b16 %v1834_v0 }
0x18c6   :  { %v1843_v61 = vsel %vm411_vm4, %v1842_v27, %v1841_v19 }
0x18c7   :  { %v1844_v28 = vpack.c.b16 %v1843_v61, %v1843_v61 }
0x18c9   :  { %2340 = vmatmul.mubr.msk.bf16.vlgmr.msra.gmra.mrb[24].mxu0 %vm148_vm0, %v1844_v28 }
0x18ca   :  { %2347 = vmatprep.mubr.msk.bf16.mxu0 %vm2713_vm3, %v2712_v57  ;;  %2344 = vmatpush3.bf16.msra.mxu0 %v2423_v51 }
0x18cb   :  { %2345 = vmatprep.subr.bf16.mxu0 %v2712_v57 }
0x18ce   :  { %2346 = vmatpush3.bf16.msra.mxu0 %v2424_v54 }
0x198a   :  { %v1601_v4 = vpop.f32.mrb[20].mxu0 }
0x198b   :  { %v1602_v5 = vadd.f32 %v3185_v59, %v1601_v4  ;;  %v2333_v29 = vpop.f32.mrb[21].mxu0 }
0x198c   :  { %v1604_v6 = vpop.f32.mrb[22].mxu0 }
0x198d   :  { %1608 = vst.msk [vmem:[#allocation11 + $0x4] sm:$0x3] %vm664_vm5, %v1602_v5  ;;  %v2334_v7 = vpop.f32.mrb[23].mxu0 }
0x199c   :  { %v1894_v10 = vpop.f32.mrb[24].mxu0 }
0x199d   :  { %v1900_v11 = vadd.f32 %v1894_v10, %v1832_v30  ;;  %v2341_v31 = vpop.f32.mrb[25].mxu0 }
0x199e   :  { %v1897_v53 = vpop.f32.mrb[26].mxu0 }
0x199f   :  { %v1901_v32 = vadd.f32 %v1900_v11, %v1710_v41  ;;  %v2342_v33 = vpop.f32.mrb[27].mxu0 }
0x19a1   :  { %v2217_v56 = vmul.f32 -1.442695, %v1901_v32 }
0x19a3   :  { %2511 = vpow2.f32 %v2217_v56 }
0x19ad   :  { %v2512_v38 = vpop.eup %2511 }
0x19ae   :  { %v1905_v37 = vadd.f32 1.0, %v2512_v38 }
0x19b0   :  { %2513 = vrcp.f32 %v1905_v37 }
0x19ba   :  { %v2514_v42 = vpop.eup %2513 }
0x19bb   :  { %v1912_v59 = vmul.f32 %v2514_v42, %v1910_v48  ;;  %v1919_v63 = vsub.f32 1.0, %v2514_v42  ;;  %v1925_v12 = vmul.f32 %v2514_v42, %v3303_v36 }
0x19bd   :  { %1914 = vrot.lane.b32.xlu1 %v1912_v59, %s3524_s4 }
0x1a2f   :  { %v1915_v47 = vpop.permute.xlu1 %1914 }
0x1a30   :  { %v1917_v49 = vadd.f32 %v1915_v47, %v1900_v11 }
0x1a32   :  { %2515 = vtanh.f32 %v1917_v49 }
0x1a3c   :  { %v2516_v13 = vpop.eup %2515 }
0x1a3d   :  { %1921 = vrot.lane.b32.xlu0 %v2516_v13, %s2714_s25 }
0x1a41   :  { %1998 = vrot.lane.b32.xlu0 %v1711_v62, %s3524_s4 }
0x1aaf   :  { %v1922_v8 = vpop.permute.xlu0 %1921 }
0x1ab0   :  { %v1924_v9 = vmul.f32 %v1922_v8, %v1919_v63 }
0x1ab2   :  { %v1926_v41 = vadd.f32 %v1925_v12, %v1924_v9 }
0x1ab3   :  { %v1999_v43 = vpop.permute.xlu0 %1998 }
0x1ab4   :  { %v1927_v21 = vpack.c.bf16 %v1926_v41, %v1926_v41 }
0x1ab6   :  { %1933 = vrot.lane.b32.xlu1 %v1927_v21, %s2714_s25 }
0x1b28   :  { %v1934_v24 = vpop.permute.xlu1 %1933 }
0x1b29   :  { %2348 = vmatmul.mubr.msk.bf16.vlgmr.msra.gmra.mrb[28].mxu0 %vm148_vm0, %v1934_v24 }
0x1bfc   :  { %v1984_v14 = vpop.f32.mrb[28].mxu0 }
0x1bfd   :  { %v1985_v39 = vadd.f32 %v2533_v25, %v1984_v14  ;;  %v2349_v15 = vpop.f32.mrb[29].mxu0 }
0x1bfe   :  { %v1987_v17 = vpop.f32.mrb[30].mxu0 }
0x1bff   :  { %v1990_v34 = vadd.f32 %v1985_v39, %v1711_v62  ;;  %v2350_v18 = vpop.f32.mrb[31].mxu0 }
0x1c01   :  { %v2221_v23 = vmul.f32 -1.442695, %v1990_v34 }
0x1c03   :  { %2517 = vpow2.f32 %v2221_v23 }
0x1c0d   :  { %v2518_v36 = vpop.eup %2517 }
0x1c0e   :  { %v1994_v26 = vadd.f32 1.0, %v2518_v36 }
0x1c10   :  { %2519 = vrcp.f32 %v1994_v26 }
0x1c1a   :  { %v2520_v35 = vpop.eup %2519 }
0x1c1b   :  { %v2001_v40 = vmul.f32 %v2520_v35, %v1999_v43  ;;  %v2008_v20 = vsub.f32 1.0, %v2520_v35  ;;  %v2014_v44 = vmul.f32 %v2520_v35, %v3341_v1 }
0x1c1d   :  { %2003 = vrot.lane.b32.xlu1 %v2001_v40, %s3524_s4  ;;  %s2113_s4 = sshll.u32 %s2715_s9, 4  ;;  %s2114_s4 = int_to_ptr.vmem [resolvable:$true] %s2113_s4 }
0x1c1e   :  { %s2645_s21 = scalar_lea.vmem %s2114_s4, 64  ;;  %p2650_p13 = scmp.lt.s32.totalorder %s2114_s4, %s2114_s4 }
0x1c1f   :  { %p2646_p12 = scmp.ne.s32.totalorder %s2114_s4, %s2645_s21  ;;  %p2651_p0 = scmp.lt.s32.totalorder %s2645_s21, %s2645_s21 }
0x1c21   :  { %p2652_p1 = por %p2651_p0, %p2650_p13 }
0x1c23   :  { %p2653_p2 = pnand %p2652_p1, %p2646_p12 }
0x1c8f   :  { %v2004_v55 = vpop.permute.xlu1 %2003 }
0x1c90   :  { %v2006_v52 = vadd.f32 %v2004_v55, %v1985_v39 }
0x1c92   :  { %2521 = vtanh.f32 %v2006_v52 }
0x1c9c   :  { %v2522_v2 = vpop.eup %2521 }
0x1c9d   :  { %2010 = vrot.lane.b32.xlu0 %v2522_v2, %s2714_s25 }
0x1ca1   :  { %2085 = vrot.lane.b32.xlu0 %v1926_v41, %s2714_s25 }
0x1d0f   :  { %v2011_v50 = vpop.permute.xlu0 %2010 }
0x1d10   :  { %v2013_v3 = vmul.f32 %v2011_v50, %v2008_v20 }
0x1d12   :  { %v2015_v22 = vadd.f32 %v2014_v44, %v2013_v3 }
0x1d13   :  { %v2086_v46 = vpop.permute.xlu0 %2085 }
0x1d14   :  { %2089 = vst.msk [vmem:[#allocation12] sm:$0x3] %vm2088_vm6, %v2086_v46  ;;  %v2016_v58 = vpack.c.bf16 %v2015_v22, %v2015_v22 }
0x1d16   :  { %2022 = vrot.lane.b32.xlu1 %v2016_v58, %s2714_s25 }
0x1d1a   :  { %2091 = vrot.lane.b32.xlu1 %v2015_v22, %s2714_s25 }
0x1d88   :  { %v2023_v0 = vpop.permute.xlu1 %2022 }
0x1d89   :  { %2356 = vmatmul.mubr.msk.bf16.vlgmr.msra.gmra.mrb[28].mxu1 %vm148_vm0, %v2023_v0 }
0x1d8c   :  { %v2092_v57 = vpop.permute.xlu1 %2091 }
0x1d8d   :  { %2095 = vst.msk [vmem:[#allocation12 + $0x2] sm:$0x3] %vm2088_vm6, %v2092_v57 }
0x1d8e   :  { %2656 = shalt.err (!%p2653_p2)
}
0x1d8f   :  { %s3526_s15 = sld [smem:[#allocation23_spill]] }
0x1d95   :  { %s2657_s23 = scalar_lea.hbm %s3526_s15, 64 }
0x1d96   :  { %p2658_p3 = scmp.ne.s32.totalorder %s3526_s15, %s2657_s23  ;;  %p2661_p4 = scmp.lt.u32.totalorder %s2657_s23, %s3526_s15 }
0x1d98   :  { %p2663_p5 = pnand %p2661_p4, %p2658_p3 }
0x1d9a   :  { %2666 = shalt.err (!%p2663_p5)
}
0x1d9b   :  { %2119 = dma.vmem_to_hbm [thread:$0]  %s2114_s4, 64, %s3526_s15, [#allocation13], %s3523_s27, %s3523_s27, %s3522_s30  }
0x1d9c   :  { %s2716_s0 = smov [#allocation11]   ;;  %v2534_v19 = vld [vmem:[%s3498_s13] ss:$0 sm:$0xff] }
0x1d9d   :  { %s2101_s26 = sshll.u32 %s2716_s0, 4  ;;  %s2102_s26 = int_to_ptr.vmem [resolvable:$true] %s2101_s26 }
0x1d9e   :  { %s2667_s20 = scalar_lea.vmem %s2102_s26, 128  ;;  %p2672_p7 = scmp.lt.s32.totalorder %s2102_s26, %s2102_s26 }
0x1d9f   :  { %p2668_p6 = scmp.ne.s32.totalorder %s2102_s26, %s2667_s20  ;;  %p2673_p8 = scmp.lt.s32.totalorder %s2667_s20, %s2667_s20 }
0x1da1   :  { %p2674_p9 = por %p2673_p8, %p2672_p7 }
0x1da3   :  { %p2675_p10 = pnand %p2674_p9, %p2668_p6 }
0x1e5c   :  { %v2073_v1 = vpop.f32.mrb[28].mxu1 }
0x1e5d   :  { %v2074_v27 = vadd.f32 %v2534_v19, %v2073_v1  ;;  %v2357_v61 = vpop.f32.mrb[29].mxu1 }
0x1e5e   :  { %v2076_v28 = vpop.f32.mrb[30].mxu1 }
0x1e5f   :  { %2080 = vst.msk [vmem:[#allocation11 + $0x6] sm:$0x3] %vm664_vm5, %v2074_v27  ;;  %v2358_v4 = vpop.f32.mrb[31].mxu1 }
0x1e60   :  { %2678 = shalt.err (!%p2675_p10)
}
0x1e61   :  { %s3527_s3 = sld [smem:[#allocation22_spill]] }
0x1e67   :  { %s2679_s6 = scalar_lea.hbm %s3527_s3, 128 }
0x1e68   :  { %p2680_p11 = scmp.ne.s32.totalorder %s3527_s3, %s2679_s6  ;;  %p2683_p12 = scmp.lt.u32.totalorder %s2679_s6, %s3527_s3 }
0x1e6a   :  { %p2685_p13 = pnand %p2683_p12, %p2680_p11 }
0x1e6c   :  { %2688 = shalt.err (!%p2685_p13)
}
0x1e6d   :  { %2107 = dma.vmem_to_hbm [thread:$0]  %s2102_s26, 128, %s3527_s3, [#allocation4], %s3523_s27, %s3523_s27, %s3522_s30  }
0x1e6e   :  { %2695 = dma.done.wait [#allocation4], 128  }
0x1e6f   :  { %2696 = vsyncadd [#allocation4], 4294967168 }
0x1e70   :  { %2697 = dma.done.wait [#allocation13], 64  }
0x1e71   :  { %2698 = vsyncadd [#allocation13], 4294967232 }
0x1e72   :  { %2130 = vsyncpa [#allocation3], 1 }
0x1e73   :  { %2131 = vsyncpa [#allocation6], 1 }
0x1e74   :  { %2132 = vsyncpa [#allocation9], 1 }
0x1e75   :  { %2133 = vsyncpa [#allocation4], 1 }
0x1e76   :  { %2134 = vsyncpa [#allocation13], 1 }

</bundles_post_ra>
